<compile_context>
chip_gen: v6e
topology: v6e:2x2x1
jax: 0.10.0
libtpu: 0.0.40
codegen_flags: <defaults>
</compile_context>

<pallas_src>
import jax
import jax.numpy as jnp
from jax import lax
from jax.experimental import pallas as pl
from jax.experimental.pallas import tpu as pltpu

# Permutations defining each 8x8 matrix: matrix k has a 1 at [i, perm[i]].
# Transcribed exactly from the PyTorch module's `matrices` dict (keys 0..7).
_D4_PERMS = (
    (0, 1, 2, 3, 4, 5, 6, 7),  # 0: '1'
    (1, 2, 3, 0, 5, 6, 7, 4),  # 1: 'r'
    (2, 3, 0, 1, 6, 7, 4, 5),  # 2: 'rr'
    (3, 0, 1, 2, 7, 4, 5, 6),  # 3: 'rrr'
    (2, 7, 0, 6, 1, 3, 4, 5),  # 4: 'srr'
    (0, 5, 2, 4, 3, 1, 6, 7),  # 5: 's'
    (3, 4, 1, 7, 2, 0, 5, 6),  # 6: 'srrr'
    (1, 6, 3, 5, 0, 2, 7, 4),  # 7: 'sr'
)

_G = 8                      # group order / matrix side
_FLAT = _G * _G             # 64 elements per flattened matrix
_PACK = 2                   # matrices per 128-lane output row
_LANES = _PACK * _FLAT      # 128  (lane-dense output width)
_BLOCK_N = 1024             # lookups per grid step
_ROWS = _BLOCK_N // _PACK   # 512 output rows per grid step


def build_d4_table(dtype=jnp.float32) -> jnp.ndarray:
    """Deterministically build the (8, 8, 8) stacked D4 regular-rep table."""
    eye = jnp.eye(_G, dtype=dtype)
    rows = [eye[jnp.array(p, dtype=jnp.int32)] for p in _D4_PERMS]
    return jnp.stack(rows, axis=0)  # (8, 8, 8)


def _pack_table(table: jnp.ndarray) -> jnp.ndarray:
    """(8, 8, 8) -> (8, 128): row g = [flat(M_g) | flat(M_g)] (one copy per
    half of the 128-lane output row)."""
    flat = table.reshape(_G, _FLAT)
    return jnp.concatenate([flat, flat], axis=-1)


def _lookup_kernel(idx_ref, table_ref, out_ref):
    # idx_ref:   VMEM (ROWS, 2) int32 — [even-slot idx, odd-slot idx] per row
    # table_ref: VMEM (8, 128)        — packed table, same block every step
    # out_ref:   VMEM (ROWS, 128)     — row r = [flat(M[idx[2r]]) | flat(M[idx[2r+1]])]
    rows = out_ref.shape[0]
    idx = idx_ref[...]
    tbl = table_ref[...]
    lane = lax.broadcasted_iota(jnp.int32, (rows, _LANES), 1)
    # Per lane: which of the two indices in this row applies.
    sel = jnp.where(lane < _FLAT, idx[:, 0:1], idx[:, 1:2])      # (ROWS, 128) int32
    acc = jnp.zeros((rows, _LANES), dtype=out_ref.dtype)
    for g in range(_G):                                          # 8 VPU selects
        acc = jnp.where(sel == g, tbl[g, :], acc)
    out_ref[...] = acc


def d4_regular_representation_batched(indices, table):
    """Look up table[indices[i]] for a vector of group indices.

    indices: int array of shape (N,), values in [0, 8)
    table:   (8, 8, 8) array from build_d4_table()
    returns: (N, 8, 8) array
    """
    indices = jnp.asarray(indices, dtype=jnp.int32).reshape(-1)
    # Clamp: VMEM reads have no runtime bounds check.
    indices = jnp.clip(indices, 0, _G - 1)
    n = indices.shape[0]
    n_pad = max(_BLOCK_N, ((n + _BLOCK_N - 1) // _BLOCK_N) * _BLOCK_N)
    idx_pad = jnp.zeros((n_pad,), dtype=jnp.int32).at[:n].set(indices)
    idx2 = idx_pad.reshape(n_pad // _PACK, _PACK)     # (n_pad/2, 2)
    packed = _pack_table(table)                       # (8, 128)

    out2 = pl.pallas_call(
        _lookup_kernel,
        out_shape=jax.ShapeDtypeStruct((n_pad // _PACK, _LANES), table.dtype),
        grid_spec=pltpu.PrefetchScalarGridSpec(
            num_scalar_prefetch=0,
            grid=(n_pad // _BLOCK_N,),
            in_specs=[
                # Blocked index input: pipelines with the grid.
                pl.BlockSpec((_ROWS, _PACK), lambda i: (i, 0)),
                # Full packed table; same block every step -> stays resident.
                pl.BlockSpec((_G, _LANES), lambda i: (0, 0)),
            ],
            out_specs=pl.BlockSpec((_ROWS, _LANES), lambda i: (i, 0)),
        ),
        compiler_params=pltpu.CompilerParams(
            dimension_semantics=("parallel",),   # blocks are independent
        ),
    )(idx2, packed)

    # Lane-dense slab -> (N, 8, 8): pure layout plumbing in the wrapper.
    return out2.reshape(n_pad, _G, _G)[:n]


def d4_regular_representation(x_idx, table):
    """Module forward: single index -> (8, 8) matrix.

    N=1 lookup bypasses Pallas (a standalone pallas_call for one 256-byte
    matrix is pure dispatch + pipeline-prologue cost, per perf review).
    """
    x = jnp.clip(jnp.asarray(x_idx, dtype=jnp.int32), 0, _G - 1)
    return table[x]


if __name__ == "__main__":
    key = jax.random.PRNGKey(0)
    table = build_d4_table(jnp.float32)

    # Batched lookup: 2048 indices -> 2 grid steps (keeps both v7x TCs busy).
    idx = jax.random.randint(key, (2048,), 0, _G, dtype=jnp.int32)
    out_batch = jax.block_until_ready(d4_regular_representation_batched(idx, table))
    ref_batch = table[idx]
    assert out_batch.shape == (2048, _G, _G) and out_batch.dtype == jnp.float32
    assert bool(jnp.array_equal(out_batch, ref_batch)), "batched lookup mismatch"

    # Ragged batch exercising the padding path.
    idx_small = idx[:100]
    out_small = jax.block_until_ready(
        d4_regular_representation_batched(idx_small, table))
    assert bool(jnp.array_equal(out_small, table[idx_small])), "ragged lookup mismatch"

    # Single-index forward (module semantics).
    out_single = jax.block_until_ready(d4_regular_representation(idx[0], table))
    assert out_single.shape == (_G, _G)
    assert bool(jnp.array_equal(out_single, table[idx[0]])), "single lookup mismatch"

    # Sanity: every matrix in the table is a valid permutation matrix.
    assert bool(jnp.all(jnp.sum(table, axis=-1) == 1.0))
    assert bool(jnp.all(jnp.sum(table, axis=-2) == 1.0))

    print("KERNEL_OK")
</pallas_src>

<mosaic_0001>
module attributes {stable_mosaic.version = 11 : i64} {
  func.func @_lookup_kernel(%arg0: i32, %arg1: memref<512x2xi32, #tpu.memory_space<vmem>>, %arg2: memref<8x128xf32, #tpu.memory_space<vmem>>, %arg3: memref<512x128xf32, #tpu.memory_space<vmem>>) attributes {dimension_semantics = [#tpu.dimension_semantics<parallel>], iteration_bounds = array<i64: 2>, scalar_prefetch = 0 : i64, scratch_operands = 0 : i64, tpu.core_type = #tpu.core_type<tc>, window_params = [{transform_indices = @transform_0, window_bounds = array<i64: 512, 2>}, {pipeline_mode = #tpu.pipeline_mode<synchronous>, transform_indices = @transform_1, window_bounds = array<i64: 8, 128>}, {transform_indices = @transform_2, window_bounds = array<i64: 512, 128>}]} {
    %c0 = arith.constant 0 : index
    %c0_0 = arith.constant 0 : index
    %0 = vector.load %arg1[%c0, %c0_0] : memref<512x2xi32, #tpu.memory_space<vmem>>, vector<512x2xi32>
    %c0_1 = arith.constant 0 : index
    %c0_2 = arith.constant 0 : index
    %1 = vector.load %arg2[%c0_1, %c0_2] : memref<8x128xf32, #tpu.memory_space<vmem>>, vector<8x128xf32>
    %2 = tpu.iota {dimensions = array<i32: 1>} : vector<512x128xi32>
    %c64_i32 = arith.constant 64 : i32
    %3 = vector.broadcast %c64_i32 : i32 to vector<512x128xi32>
    %4 = arith.cmpi slt, %2, %3 : vector<512x128xi32>
    %5 = vector.extract_strided_slice %0 {offsets = [0, 0], sizes = [512, 1], strides = [1, 1]} : vector<512x2xi32> to vector<512x1xi32>
    %6 = vector.extract_strided_slice %0 {offsets = [0, 1], sizes = [512, 1], strides = [1, 1]} : vector<512x2xi32> to vector<512x1xi32>
    %7 = vector.shape_cast %5 : vector<512x1xi32> to vector<512x1xi32>
    %8 = vector.broadcast %7 : vector<512x1xi32> to vector<512x128xi32>
    %9 = vector.shape_cast %6 : vector<512x1xi32> to vector<512x1xi32>
    %10 = vector.broadcast %9 : vector<512x1xi32> to vector<512x128xi32>
    %11 = arith.select %4, %8, %10 : vector<512x128xi1>, vector<512x128xi32>
    %cst = arith.constant 0.000000e+00 : f32
    %12 = vector.broadcast %cst : f32 to vector<512x128xf32>
    %c0_i32 = arith.constant 0 : i32
    %13 = vector.broadcast %c0_i32 : i32 to vector<512x128xi32>
    %14 = arith.cmpi eq, %11, %13 : vector<512x128xi32>
    %15 = vector.extract_strided_slice %1 {offsets = [0, 0], sizes = [1, 128], strides = [1, 1]} : vector<8x128xf32> to vector<1x128xf32>
    %16 = vector.shape_cast %15 : vector<1x128xf32> to vector<128xf32>
    %17 = vector.shape_cast %16 : vector<128xf32> to vector<1x128xf32>
    %18 = vector.broadcast %17 : vector<1x128xf32> to vector<512x128xf32>
    %19 = arith.select %14, %18, %12 : vector<512x128xi1>, vector<512x128xf32>
    %c1_i32 = arith.constant 1 : i32
    %20 = vector.broadcast %c1_i32 : i32 to vector<512x128xi32>
    %21 = arith.cmpi eq, %11, %20 : vector<512x128xi32>
    %22 = vector.extract_strided_slice %1 {offsets = [1, 0], sizes = [1, 128], strides = [1, 1]} : vector<8x128xf32> to vector<1x128xf32>
    %23 = vector.shape_cast %22 : vector<1x128xf32> to vector<128xf32>
    %24 = vector.shape_cast %23 : vector<128xf32> to vector<1x128xf32>
    %25 = vector.broadcast %24 : vector<1x128xf32> to vector<512x128xf32>
    %26 = arith.select %21, %25, %19 : vector<512x128xi1>, vector<512x128xf32>
    %c2_i32 = arith.constant 2 : i32
    %27 = vector.broadcast %c2_i32 : i32 to vector<512x128xi32>
    %28 = arith.cmpi eq, %11, %27 : vector<512x128xi32>
    %29 = vector.extract_strided_slice %1 {offsets = [2, 0], sizes = [1, 128], strides = [1, 1]} : vector<8x128xf32> to vector<1x128xf32>
    %30 = vector.shape_cast %29 : vector<1x128xf32> to vector<128xf32>
    %31 = vector.shape_cast %30 : vector<128xf32> to vector<1x128xf32>
    %32 = vector.broadcast %31 : vector<1x128xf32> to vector<512x128xf32>
    %33 = arith.select %28, %32, %26 : vector<512x128xi1>, vector<512x128xf32>
    %c3_i32 = arith.constant 3 : i32
    %34 = vector.broadcast %c3_i32 : i32 to vector<512x128xi32>
    %35 = arith.cmpi eq, %11, %34 : vector<512x128xi32>
    %36 = vector.extract_strided_slice %1 {offsets = [3, 0], sizes = [1, 128], strides = [1, 1]} : vector<8x128xf32> to vector<1x128xf32>
    %37 = vector.shape_cast %36 : vector<1x128xf32> to vector<128xf32>
    %38 = vector.shape_cast %37 : vector<128xf32> to vector<1x128xf32>
    %39 = vector.broadcast %38 : vector<1x128xf32> to vector<512x128xf32>
    %40 = arith.select %35, %39, %33 : vector<512x128xi1>, vector<512x128xf32>
    %c4_i32 = arith.constant 4 : i32
    %41 = vector.broadcast %c4_i32 : i32 to vector<512x128xi32>
    %42 = arith.cmpi eq, %11, %41 : vector<512x128xi32>
    %43 = vector.extract_strided_slice %1 {offsets = [4, 0], sizes = [1, 128], strides = [1, 1]} : vector<8x128xf32> to vector<1x128xf32>
    %44 = vector.shape_cast %43 : vector<1x128xf32> to vector<128xf32>
    %45 = vector.shape_cast %44 : vector<128xf32> to vector<1x128xf32>
    %46 = vector.broadcast %45 : vector<1x128xf32> to vector<512x128xf32>
    %47 = arith.select %42, %46, %40 : vector<512x128xi1>, vector<512x128xf32>
    %c5_i32 = arith.constant 5 : i32
    %48 = vector.broadcast %c5_i32 : i32 to vector<512x128xi32>
    %49 = arith.cmpi eq, %11, %48 : vector<512x128xi32>
    %50 = vector.extract_strided_slice %1 {offsets = [5, 0], sizes = [1, 128], strides = [1, 1]} : vector<8x128xf32> to vector<1x128xf32>
    %51 = vector.shape_cast %50 : vector<1x128xf32> to vector<128xf32>
    %52 = vector.shape_cast %51 : vector<128xf32> to vector<1x128xf32>
    %53 = vector.broadcast %52 : vector<1x128xf32> to vector<512x128xf32>
    %54 = arith.select %49, %53, %47 : vector<512x128xi1>, vector<512x128xf32>
    %c6_i32 = arith.constant 6 : i32
    %55 = vector.broadcast %c6_i32 : i32 to vector<512x128xi32>
    %56 = arith.cmpi eq, %11, %55 : vector<512x128xi32>
    %57 = vector.extract_strided_slice %1 {offsets = [6, 0], sizes = [1, 128], strides = [1, 1]} : vector<8x128xf32> to vector<1x128xf32>
    %58 = vector.shape_cast %57 : vector<1x128xf32> to vector<128xf32>
    %59 = vector.shape_cast %58 : vector<128xf32> to vector<1x128xf32>
    %60 = vector.broadcast %59 : vector<1x128xf32> to vector<512x128xf32>
    %61 = arith.select %56, %60, %54 : vector<512x128xi1>, vector<512x128xf32>
    %c7_i32 = arith.constant 7 : i32
    %62 = vector.broadcast %c7_i32 : i32 to vector<512x128xi32>
    %63 = arith.cmpi eq, %11, %62 : vector<512x128xi32>
    %64 = vector.extract_strided_slice %1 {offsets = [7, 0], sizes = [1, 128], strides = [1, 1]} : vector<8x128xf32> to vector<1x128xf32>
    %65 = vector.shape_cast %64 : vector<1x128xf32> to vector<128xf32>
    %66 = vector.shape_cast %65 : vector<128xf32> to vector<1x128xf32>
    %67 = vector.broadcast %66 : vector<1x128xf32> to vector<512x128xf32>
    %68 = arith.select %63, %67, %61 : vector<512x128xi1>, vector<512x128xf32>
    %c0_3 = arith.constant 0 : index
    %c0_4 = arith.constant 0 : index
    %69 = vector.load %arg3[%c0_3, %c0_4] : memref<512x128xf32, #tpu.memory_space<vmem>>, vector<512x128xf32>
    tpu.vector_store %arg3[%c0_3, %c0_4], %68 {strides = array<i32>} : memref<512x128xf32, #tpu.memory_space<vmem>>, vector<512x128xf32>,
    return
  }
  func.func @transform_0(%arg0: i32) -> (i32, i32) {
    %c0_i32 = arith.constant 0 : i32
    %c0_i32_0 = arith.constant 0 : i32
    return %arg0, %c0_i32 : i32, i32
  }
  func.func @transform_1(%arg0: i32) -> (i32, i32) {
    %c0_i32 = arith.constant 0 : i32
    %c0_i32_0 = arith.constant 0 : i32
    %c0_i32_1 = arith.constant 0 : i32
    return %c0_i32, %c0_i32_0 : i32, i32
  }
  func.func @transform_2(%arg0: i32) -> (i32, i32) {
    %c0_i32 = arith.constant 0 : i32
    %c0_i32_0 = arith.constant 0 : i32
    return %arg0, %c0_i32 : i32, i32
  }
}

</mosaic_0001>

<bundles_post_ra>
// kernel: tpu_custom_call.1
= control target key start
LH: loop header
LB: loop body
LE: loop exit
PB: predicated region body
PF: predicated region fallthrough
CT: control target
= control target key end

     0   :  { %7 = vsyncpa [#allocation3], 0  ;;  %s3350_s0 = inlined_call_operand.vmem [shape: s32[1024,2], index: 0, kind: input, shape index: {}]   ;;  %s3351_s1 = inlined_call_operand.vmem [shape: f32[8,128], index: 1, kind: input, shape index: {}]   ;;  %s3352_s2 = inlined_call_operand.hbm [shape: f32[1024,128], index: 2, kind: output, shape index: {}]  }
   0x1   :  { %9 = vsyncpa [#allocation3 + $0x1], 0  ;;  %s1999_s9 = smov 0   ;;  %s2001_s10 = smov 0  }
   0x2   :  { %s2003_s11 = smov 0   ;;  %s2005_s12 = smov 0  }
   0x3 LB: > { %s2020_s13 = sadd.s32 4294967295, %s1977_s12   ;;  %s1857_s14 = sadd.s32 4294967294, %s1977_s12   ;;  %s1977_s12 = sphi %s2005_s12, %s3423_s12   ;;  %s1973_s11 = sphi %s2003_s11, %s3422_s11   ;;  %s1969_s10 = sphi %s2001_s10, %s3421_s10   ;;  %s1965_s9 = sphi %s1999_s9, %s3420_s9  }
   0x4   : > { %s2024_s15 = sadd.s32 1, %s1977_s12   ;;  %s69_s16 = sadd.s32 1, %s1973_s11 }
   0x5   : > { %s66_s17 = ssub.s32 %s1977_s12, %s2024_s15  ;;  %p79_p0 = scmp.ne.s32.totalorder %s1973_s11, %s1969_s10 }
   0x6   : > { %p67_p1 = scmp.eq.s32.totalorder %s66_s17, 0  ;;  %p80_p2 = scmp.eq.s32.totalorder %s2020_s13, 1 }
   0x7   : > { %p85_p3 = scmp.ne.s32.totalorder %s1969_s10, %s1965_s9  ;;  %p86_p4 = scmp.eq.s32.totalorder %s1857_s14, 1 }
   0x8   : > { %s2035_s18 = scalar_select %p67_p1, %s1973_s11, %s69_s16  }
   0x9   : > { %p2037_p5 = por %p80_p2, %p79_p0  ;;  %p2041_p6 = por %p86_p4, %p85_p3 }
   0xa   : > { %p1860_p7 = scmp.ge.s32.totalorder %s1977_s12, 1  ;;  %p116_p8 = scmp.lt.s32.totalorder %s1977_s12, 3 }
   0xc   : > { %p117_p9 = pnand %p1860_p7, %p116_p8 }
   0xe   : > { %120 = sbr.rel (%p117_p9) target bundleno = 568 (0x238), region = 28 }
  0x13   : > { %s1862_s21 = sshll.u32 %s2020_s13, 6  ;;  %v1979_v0 = vmov 0   ;;  %s135_s28 = sand.u32 1, %s1969_s10  }
  0x14   : > { %1914 = vset.pattern.permute.xlu1 %v1979_v0  ;;  %1913 = vset.pattern.permute.xlu0 %v1979_v0  ;;  %p139_p10 = scmp.lt.s32.totalorder %s1862_s21, 127  ;;  %s1861_s29 = sshll.u32 %s135_s28, 9 }
  0x15   : > { %s2556_s30 = scalar_lea.vmem [#allocation2], %s1861_s29  ;;  %s1869_s3 = sshll.u32 %s2020_s13, 13 }
  0x16   : > { %s3425_s21 = smov (!%p139_p10, %s1862_s21), 127  ;;  %s1795_s4 = sshll.u32 %s2556_s30, 4  ;;  %s3303_s4 = int_to_ptr.vmem [resolvable:$true] %s1795_s4 }
  0x17   : > { %s1863_s22 = sshll.u32 %s3425_s21, 3  ;;  %s3301_s7 = scalar_lea.hbm %s3352_s2, %s1869_s3 }
  0x18   : > { %s2051_s25 = scalar_lea.vmem %s3350_s0, %s1863_s22  ;;  %s3310_s8 = scalar_lea.sflag [#allocation3], %s135_s28 }
  0x19   : > { %v2054_v1 = vld [vmem:[%s2051_s25 + $0x10] sm:$0xff]  ;;  %v2057_v2 = vld [vmem:[%s2051_s25] sm:$0xff]  ;;  %v2062_v3 = vld [vmem:[%s2051_s25 + $0x18] sm:$0xff]  ;;  %s1917_s13 = scalar_lea.vmem %s3303_s4, 8192  ;;  %s1981_s14 = smov [#allocation2]  }
  0x1a   : > { %220 = vperm.xlu1 %1914, %v2054_v1   ;;  %214 = vperm.xlu0 %1913, %v2057_v2   ;;  %v2065_v4 = vld [vmem:[%s2051_s25 + $0x8] sm:$0xff]  ;;  %v2073_v6 = vld [vmem:[%s2051_s25 + $0x20] sm:$0xff]  ;;  %v2078_v7 = vld [vmem:[%s2051_s25 + $0x38] sm:$0xff]  ;;  %p1918_p11 = scmp.ne.s32.totalorder %s3303_s4, %s1917_s13  ;;  %s1921_s16 = sshll.u32 %s1981_s14, 4  ;;  %s1922_s16 = int_to_ptr.vmem [resolvable:$false] %s1921_s16 }
  0x1b   : > { %v2070_v5 = vld [vmem:[%s2051_s25 + $0x28] sm:$0xff]  ;;  %v2081_v8 = vld [vmem:[%s2051_s25 + $0x30] sm:$0xff]  ;;  %v2089_v10 = vld [vmem:[%s2051_s25 + $0x40] sm:$0xff]  ;;  %s1923_s17 = scalar_lea.vmem %s1922_s16, 16384  ;;  %p1924_p0 = scmp.lt.s32.totalorder %s3303_s4, %s1922_s16 }
  0x1c   : > { %v2086_v9 = vld [vmem:[%s2051_s25 + $0x48] sm:$0xff]  ;;  %v2094_v11 = vld [vmem:[%s2051_s25 + $0x58] sm:$0xff]  ;;  %v2097_v12 = vld [vmem:[%s2051_s25 + $0x50] sm:$0xff]  ;;  %p1919_p12 = pnand %p1918_p11, %p2037_p5  ;;  %p1925_p1 = scmp.lt.s32.totalorder %s1923_s17, %s1917_s13 }
  0x1d   : > { %v2102_v13 = vld [vmem:[%s2051_s25 + $0x68] sm:$0xff]  ;;  %v2105_v14 = vld [vmem:[%s2051_s25 + $0x60] sm:$0xff]  ;;  %v2110_v15 = vld [vmem:[%s2051_s25 + $0x78] sm:$0xff] }
  0x1e   : > { %223 = vperm.xlu1 %1914, %v2062_v3   ;;  %217 = vperm.xlu0 %1913, %v2065_v4   ;;  %v2113_v16 = vld [vmem:[%s2051_s25 + $0x70] sm:$0xff]  ;;  %v2118_v17 = vld [vmem:[%s2051_s25 + $0x88] sm:$0xff]  ;;  %v2121_v18 = vld [vmem:[%s2051_s25 + $0x80] sm:$0xff]  ;;  %p1920_p13 = pneg %p1919_p12  ;;  %p1926_p2 = por %p1925_p1, %p1924_p0 }
  0x1f   : > { %v2126_v19 = vld [vmem:[%s2051_s25 + $0x98] sm:$0xff]  ;;  %v2129_v20 = vld [vmem:[%s2051_s25 + $0x90] sm:$0xff]  ;;  %v2134_v21 = vld [vmem:[%s2051_s25 + $0xa8] sm:$0xff] }
  0x20   : > { %v2137_v22 = vld [vmem:[%s2051_s25 + $0xa0] sm:$0xff]  ;;  %v2142_v23 = vld [vmem:[%s2051_s25 + $0xb8] sm:$0xff]  ;;  %v2145_v24 = vld [vmem:[%s2051_s25 + $0xb0] sm:$0xff]  ;;  %p1927_p3 = pnand %p1926_p2, %p1920_p13 }
  0x21   : > { %v2150_v25 = vld [vmem:[%s2051_s25 + $0xc8] sm:$0xff]  ;;  %v2153_v26 = vld [vmem:[%s2051_s25 + $0xc0] sm:$0xff]  ;;  %v2158_v27 = vld [vmem:[%s2051_s25 + $0xd8] sm:$0xff] }
  0x22   : > { %229 = vperm.xlu1 %1914, %v2070_v5   ;;  %226 = vperm.xlu0 %1913, %v2073_v6   ;;  %v2161_v28 = vld [vmem:[%s2051_s25 + $0xd0] sm:$0xff]  ;;  %v2166_v29 = vld [vmem:[%s2051_s25 + $0xe8] sm:$0xff]  ;;  %v2169_v30 = vld [vmem:[%s2051_s25 + $0xe0] sm:$0xff] }
  0x23   : > { %v2174_v31 = vld [vmem:[%s2051_s25 + $0xf8] sm:$0xff]  ;;  %v2177_v32 = vld [vmem:[%s2051_s25 + $0xf0] sm:$0xff]  ;;  %v2182_v33 = vld [vmem:[%s2051_s25 + $0x108] sm:$0xff] }
  0x24   : > { %v2185_v34 = vld [vmem:[%s2051_s25 + $0x100] sm:$0xff]  ;;  %v2190_v35 = vld [vmem:[%s2051_s25 + $0x118] sm:$0xff]  ;;  %v2193_v36 = vld [vmem:[%s2051_s25 + $0x110] sm:$0xff] }
  0x25   : > { %v2198_v37 = vld [vmem:[%s2051_s25 + $0x128] sm:$0xff]  ;;  %v2201_v38 = vld [vmem:[%s2051_s25 + $0x120] sm:$0xff]  ;;  %v2206_v39 = vld [vmem:[%s2051_s25 + $0x138] sm:$0xff] }
  0x26   : > { %235 = vperm.xlu1 %1914, %v2078_v7   ;;  %232 = vperm.xlu0 %1913, %v2081_v8   ;;  %v2209_v40 = vld [vmem:[%s2051_s25 + $0x130] sm:$0xff]  ;;  %v2214_v41 = vld [vmem:[%s2051_s25 + $0x148] sm:$0xff]  ;;  %v2217_v42 = vld [vmem:[%s2051_s25 + $0x140] sm:$0xff] }
  0x27   : > { %v2222_v43 = vld [vmem:[%s2051_s25 + $0x158] sm:$0xff]  ;;  %v2225_v44 = vld [vmem:[%s2051_s25 + $0x150] sm:$0xff]  ;;  %v2230_v45 = vld [vmem:[%s2051_s25 + $0x168] sm:$0xff] }
  0x28   : > { %v2233_v46 = vld [vmem:[%s2051_s25 + $0x160] sm:$0xff]  ;;  %v2238_v47 = vld [vmem:[%s2051_s25 + $0x178] sm:$0xff]  ;;  %v2241_v48 = vld [vmem:[%s2051_s25 + $0x170] sm:$0xff] }
  0x29   : > { %v2246_v49 = vld [vmem:[%s2051_s25 + $0x188] sm:$0xff]  ;;  %v2249_v50 = vld [vmem:[%s2051_s25 + $0x180] sm:$0xff]  ;;  %v2254_v51 = vld [vmem:[%s2051_s25 + $0x198] sm:$0xff] }
  0x2a   : > { %241 = vperm.xlu1 %1914, %v2086_v9   ;;  %238 = vperm.xlu0 %1913, %v2089_v10   ;;  %v2257_v52 = vld [vmem:[%s2051_s25 + $0x190] sm:$0xff]  ;;  %v2262_v53 = vld [vmem:[%s2051_s25 + $0x1a8] sm:$0xff]  ;;  %v2265_v54 = vld [vmem:[%s2051_s25 + $0x1a0] sm:$0xff] }
  0x2b   : > { %v2270_v55 = vld [vmem:[%s2051_s25 + $0x1b8] sm:$0xff]  ;;  %v2273_v56 = vld [vmem:[%s2051_s25 + $0x1b0] sm:$0xff]  ;;  %v2278_v57 = vld [vmem:[%s2051_s25 + $0x1c8] sm:$0xff] }
  0x2c   : > { %3362 = vst [vmem:[#allocation5_spill] sm:$0xff] %v2270_v55  ;;  %3363 = vst [vmem:[#allocation6_spill] sm:$0xff] %v2278_v57  ;;  %v2281_v58 = vld [vmem:[%s2051_s25 + $0x1c0] sm:$0xff]  ;;  %v2286_v59 = vld [vmem:[%s2051_s25 + $0x1d8] sm:$0xff] }
  0x2d   : > { %3364 = vst [vmem:[#allocation7_spill] sm:$0xff] %v2281_v58  ;;  %3365 = vst [vmem:[#allocation8_spill] sm:$0xff] %v2286_v59  ;;  %v2289_v60 = vld [vmem:[%s2051_s25 + $0x1d0] sm:$0xff]  ;;  %v2294_v61 = vld [vmem:[%s2051_s25 + $0x1e8] sm:$0xff] }
  0x2e   : > { %247 = vperm.xlu1 %1914, %v2094_v11   ;;  %244 = vperm.xlu0 %1913, %v2097_v12   ;;  %3366 = vst [vmem:[#allocation9_spill] sm:$0xff] %v2289_v60  ;;  %3367 = vst [vmem:[#allocation10_spill] sm:$0xff] %v2294_v61  ;;  %v2297_v62 = vld [vmem:[%s2051_s25 + $0x1e0] sm:$0xff]  ;;  %v2302_v63 = vld [vmem:[%s2051_s25 + $0x1f8] sm:$0xff] }
  0x2f   : > { %3368 = vst [vmem:[#allocation11_spill] sm:$0xff] %v2302_v63  ;;  %v2305_v0 = vld [vmem:[%s2051_s25 + $0x1f0] sm:$0xff] }
  0x32   : > { %253 = vperm.xlu1 %1914, %v2102_v13   ;;  %250 = vperm.xlu0 %1913, %v2105_v14  }
  0x36   : > { %259 = vperm.xlu1 %1914, %v2110_v15   ;;  %256 = vperm.xlu0 %1913, %v2113_v16  }
  0x3a   : > { %265 = vperm.xlu1 %1914, %v2118_v17   ;;  %262 = vperm.xlu0 %1913, %v2121_v18  }
  0x3e   : > { %271 = vperm.xlu1 %1914, %v2126_v19   ;;  %268 = vperm.xlu0 %1913, %v2129_v20  }
  0x42   : > { %277 = vperm.xlu1 %1914, %v2134_v21   ;;  %274 = vperm.xlu0 %1913, %v2137_v22  }
  0x46   : > { %283 = vperm.xlu1 %1914, %v2142_v23   ;;  %280 = vperm.xlu0 %1913, %v2145_v24  }
  0x4a   : > { %289 = vperm.xlu1 %1914, %v2150_v25   ;;  %286 = vperm.xlu0 %1913, %v2153_v26  }
  0x4e   : > { %295 = vperm.xlu1 %1914, %v2158_v27   ;;  %292 = vperm.xlu0 %1913, %v2161_v28  }
  0x52   : > { %301 = vperm.xlu1 %1914, %v2166_v29   ;;  %298 = vperm.xlu0 %1913, %v2169_v30  }
  0x56   : > { %307 = vperm.xlu1 %1914, %v2174_v31   ;;  %304 = vperm.xlu0 %1913, %v2177_v32  }
  0x5a   : > { %313 = vperm.xlu1 %1914, %v2182_v33   ;;  %310 = vperm.xlu0 %1913, %v2185_v34  }
  0x5e   : > { %319 = vperm.xlu1 %1914, %v2190_v35   ;;  %316 = vperm.xlu0 %1913, %v2193_v36  }
  0x62   : > { %325 = vperm.xlu1 %1914, %v2198_v37   ;;  %322 = vperm.xlu0 %1913, %v2201_v38  }
  0x66   : > { %331 = vperm.xlu1 %1914, %v2206_v39   ;;  %328 = vperm.xlu0 %1913, %v2209_v40  }
  0x6a   : > { %337 = vperm.xlu1 %1914, %v2214_v41   ;;  %334 = vperm.xlu0 %1913, %v2217_v42  }
  0x6e   : > { %343 = vperm.xlu1 %1914, %v2222_v43   ;;  %340 = vperm.xlu0 %1913, %v2225_v44  }
  0x72   : > { %349 = vperm.xlu1 %1914, %v2230_v45   ;;  %346 = vperm.xlu0 %1913, %v2233_v46  }
  0x76   : > { %355 = vperm.xlu1 %1914, %v2238_v47   ;;  %352 = vperm.xlu0 %1913, %v2241_v48  }
  0x7a   : > { %361 = vperm.xlu1 %1914, %v2246_v49   ;;  %358 = vperm.xlu0 %1913, %v2249_v50  }
  0x7e   : > { %367 = vperm.xlu1 %1914, %v2254_v51   ;;  %364 = vperm.xlu0 %1913, %v2257_v52  }
  0x82   : > { %373 = vperm.xlu1 %1914, %v2262_v53   ;;  %370 = vperm.xlu0 %1913, %v2265_v54  }
  0x86   : > { %379 = vperm.xlu1 %1914, %v2270_v55   ;;  %376 = vperm.xlu0 %1913, %v2273_v56   ;;  %v1980_v55 = vmov 1  }
  0x8a   : > { %385 = vperm.xlu1 %1914, %v2278_v57   ;;  %382 = vperm.xlu0 %1913, %v2281_v58  }
  0x8e   : > { %391 = vperm.xlu1 %1914, %v2286_v59   ;;  %388 = vperm.xlu0 %1913, %v2289_v60  }
  0x92   : > { %397 = vperm.xlu1 %1914, %v2294_v61   ;;  %394 = vperm.xlu0 %1913, %v2297_v62  }
  0x95   : > { %v2307_v57 = vpop.permute.xlu1 %220  ;;  %v2309_v58 = vpop.permute.xlu0 %214 }
  0x96   : > { %3369 = vst [vmem:[#allocation12_spill] sm:$0xff] %v2307_v57  ;;  %403 = vperm.xlu1 %1914, %v2302_v63   ;;  %400 = vperm.xlu0 %1913, %v2305_v0  }
  0x99   : > { %v2313_v59 = vpop.permute.xlu1 %223  ;;  %v2315_v60 = vpop.permute.xlu0 %217 }
  0x9a   : > { %3370 = vst [vmem:[#allocation13_spill] sm:$0xff] %v2313_v59  ;;  %1916 = vset.pattern.permute.xlu1 %v1980_v55  ;;  %1915 = vset.pattern.permute.xlu0 %v1980_v55 }
  0x9b   : > { %409 = vperm.xlu1 %1916, %v2065_v4   ;;  %406 = vperm.xlu0 %1915, %v2057_v2  }
  0x9d   : > { %v2319_v61 = vpop.permute.xlu1 %229  ;;  %v2321_v57 = vpop.permute.xlu0 %226 }
  0x9f   : > { %412 = vperm.xlu1 %1916, %v2054_v1   ;;  %415 = vperm.xlu0 %1915, %v2062_v3  }
  0xa1   : > { %v2325_v63 = vpop.permute.xlu1 %235  ;;  %v2327_v59 = vpop.permute.xlu0 %232 }
  0xa3   : > { %418 = vperm.xlu1 %1916, %v2073_v6   ;;  %421 = vperm.xlu0 %1915, %v2070_v5  }
  0xa5   : > { %v2331_v55 = vpop.permute.xlu1 %241  ;;  %v2333_v4 = vpop.permute.xlu0 %238 }
  0xa7   : > { %424 = vperm.xlu1 %1916, %v2081_v8   ;;  %427 = vperm.xlu0 %1915, %v2078_v7  }
  0xa9   : > { %v2337_v2 = vpop.permute.xlu1 %247  ;;  %v2339_v1 = vpop.permute.xlu0 %244 }
  0xab   : > { %430 = vperm.xlu1 %1916, %v2089_v10   ;;  %433 = vperm.xlu0 %1915, %v2086_v9  }
  0xad   : > { %v2343_v3 = vpop.permute.xlu1 %253  ;;  %v2345_v6 = vpop.permute.xlu0 %250 }
  0xaf   : > { %436 = vperm.xlu1 %1916, %v2097_v12   ;;  %439 = vperm.xlu0 %1915, %v2094_v11  }
  0xb1   : > { %v2349_v5 = vpop.permute.xlu1 %259  ;;  %v2351_v8 = vpop.permute.xlu0 %256 }
  0xb3   : > { %442 = vperm.xlu1 %1916, %v2105_v14   ;;  %445 = vperm.xlu0 %1915, %v2102_v13  }
  0xb5   : > { %v2355_v7 = vpop.permute.xlu1 %265  ;;  %v2357_v10 = vpop.permute.xlu0 %262 }
  0xb7   : > { %448 = vperm.xlu1 %1916, %v2113_v16   ;;  %451 = vperm.xlu0 %1915, %v2110_v15  }
  0xb9   : > { %v2361_v9 = vpop.permute.xlu1 %271  ;;  %v2363_v12 = vpop.permute.xlu0 %268 }
  0xbb   : > { %454 = vperm.xlu1 %1916, %v2121_v18   ;;  %457 = vperm.xlu0 %1915, %v2118_v17  }
  0xbd   : > { %v2367_v11 = vpop.permute.xlu1 %277  ;;  %v2369_v14 = vpop.permute.xlu0 %274 }
  0xbf   : > { %460 = vperm.xlu1 %1916, %v2129_v20   ;;  %463 = vperm.xlu0 %1915, %v2126_v19  }
  0xc1   : > { %v2373_v13 = vpop.permute.xlu1 %283  ;;  %v2375_v16 = vpop.permute.xlu0 %280 }
  0xc3   : > { %466 = vperm.xlu1 %1916, %v2137_v22   ;;  %469 = vperm.xlu0 %1915, %v2134_v21  }
  0xc5   : > { %v2379_v15 = vpop.permute.xlu1 %289  ;;  %v2381_v18 = vpop.permute.xlu0 %286 }
  0xc7   : > { %472 = vperm.xlu1 %1916, %v2145_v24   ;;  %475 = vperm.xlu0 %1915, %v2142_v23  }
  0xc9   : > { %v2385_v17 = vpop.permute.xlu1 %295  ;;  %v2387_v20 = vpop.permute.xlu0 %292 }
  0xcb   : > { %478 = vperm.xlu1 %1916, %v2153_v26   ;;  %481 = vperm.xlu0 %1915, %v2150_v25  }
  0xcd   : > { %v2391_v19 = vpop.permute.xlu1 %301  ;;  %v2393_v22 = vpop.permute.xlu0 %298 }
  0xcf   : > { %484 = vperm.xlu1 %1916, %v2161_v28   ;;  %487 = vperm.xlu0 %1915, %v2158_v27  }
  0xd1   : > { %v2397_v21 = vpop.permute.xlu1 %307  ;;  %v2399_v24 = vpop.permute.xlu0 %304 }
  0xd3   : > { %490 = vperm.xlu1 %1916, %v2169_v30   ;;  %493 = vperm.xlu0 %1915, %v2166_v29  }
  0xd5   : > { %v2403_v23 = vpop.permute.xlu1 %313  ;;  %v2405_v26 = vpop.permute.xlu0 %310 }
  0xd7   : > { %496 = vperm.xlu1 %1916, %v2177_v32   ;;  %499 = vperm.xlu0 %1915, %v2174_v31  }
  0xd9   : > { %v2409_v25 = vpop.permute.xlu1 %319  ;;  %v2411_v28 = vpop.permute.xlu0 %316 }
  0xdb   : > { %502 = vperm.xlu1 %1916, %v2185_v34   ;;  %505 = vperm.xlu0 %1915, %v2182_v33  }
  0xdd   : > { %v2415_v27 = vpop.permute.xlu1 %325  ;;  %v2417_v30 = vpop.permute.xlu0 %322 }
  0xdf   : > { %508 = vperm.xlu1 %1916, %v2193_v36   ;;  %511 = vperm.xlu0 %1915, %v2190_v35  }
  0xe1   : > { %v2421_v29 = vpop.permute.xlu1 %331  ;;  %v2423_v32 = vpop.permute.xlu0 %328 }
  0xe3   : > { %514 = vperm.xlu1 %1916, %v2201_v38   ;;  %517 = vperm.xlu0 %1915, %v2198_v37  }
  0xe5   : > { %v2427_v31 = vpop.permute.xlu1 %337  ;;  %v2429_v34 = vpop.permute.xlu0 %334 }
  0xe7   : > { %520 = vperm.xlu1 %1916, %v2209_v40   ;;  %523 = vperm.xlu0 %1915, %v2206_v39  }
  0xe9   : > { %v2433_v33 = vpop.permute.xlu1 %343  ;;  %v2435_v36 = vpop.permute.xlu0 %340 }
  0xeb   : > { %526 = vperm.xlu1 %1916, %v2217_v42   ;;  %529 = vperm.xlu0 %1915, %v2214_v41  }
  0xed   : > { %v2439_v35 = vpop.permute.xlu1 %349  ;;  %v2441_v38 = vpop.permute.xlu0 %346 }
  0xee   : > { %3371 = vst [vmem:[#allocation14_spill] sm:$0xff] %v2439_v35  ;;  %3372 = vst [vmem:[#allocation15_spill] sm:$0xff] %v2441_v38 }
  0xef   : > { %532 = vperm.xlu1 %1916, %v2225_v44   ;;  %535 = vperm.xlu0 %1915, %v2222_v43  }
  0xf1   : > { %v2445_v37 = vpop.permute.xlu1 %355  ;;  %v2447_v40 = vpop.permute.xlu0 %352 }
  0xf2   : > { %3373 = vst [vmem:[#allocation16_spill] sm:$0xff] %v2445_v37  ;;  %3374 = vst [vmem:[#allocation17_spill] sm:$0xff] %v2447_v40 }
  0xf3   : > { %538 = vperm.xlu1 %1916, %v2233_v46   ;;  %541 = vperm.xlu0 %1915, %v2230_v45  }
  0xf5   : > { %v2451_v39 = vpop.permute.xlu1 %361  ;;  %v2453_v42 = vpop.permute.xlu0 %358 }
  0xf6   : > { %3375 = vst [vmem:[#allocation18_spill] sm:$0xff] %v2451_v39  ;;  %3376 = vst [vmem:[#allocation19_spill] sm:$0xff] %v2453_v42 }
  0xf7   : > { %544 = vperm.xlu1 %1916, %v2241_v48   ;;  %547 = vperm.xlu0 %1915, %v2238_v47  }
  0xf9   : > { %v2457_v41 = vpop.permute.xlu1 %367  ;;  %v2459_v44 = vpop.permute.xlu0 %364 }
  0xfa   : > { %3377 = vst [vmem:[#allocation20_spill] sm:$0xff] %v2457_v41  ;;  %3378 = vst [vmem:[#allocation21_spill] sm:$0xff] %v2459_v44 }
  0xfb   : > { %550 = vperm.xlu1 %1916, %v2249_v50   ;;  %553 = vperm.xlu0 %1915, %v2246_v49   ;;  %v3385_v49 = vld [vmem:[#allocation5_spill] sm:$0xff] }
  0xfd   : > { %v2463_v43 = vpop.permute.xlu1 %373  ;;  %v2465_v46 = vpop.permute.xlu0 %370 }
  0xfe   : > { %3379 = vst [vmem:[#allocation22_spill] sm:$0xff] %v2463_v43  ;;  %3380 = vst [vmem:[#allocation23_spill] sm:$0xff] %v2465_v46  ;;  %v3392_v46 = vld [vmem:[#allocation9_spill] sm:$0xff] }
  0xff   : > { %556 = vperm.xlu1 %1916, %v2257_v52   ;;  %559 = vperm.xlu0 %1915, %v2254_v51   ;;  %v210_v51 = vlaneseq }
 0x101   : > { %v2469_v45 = vpop.permute.xlu1 %379  ;;  %v2471_v48 = vpop.permute.xlu0 %376 }
 0x102   : > { %3381 = vst [vmem:[#allocation24_spill] sm:$0xff] %v2469_v45  ;;  %3382 = vst [vmem:[#allocation25_spill] sm:$0xff] %v2471_v48  ;;  %v3388_v45 = vld [vmem:[#allocation7_spill] sm:$0xff]  ;;  %v3389_v48 = vld [vmem:[#allocation6_spill] sm:$0xff] }
 0x103   : > { %562 = vperm.xlu1 %1916, %v2265_v54   ;;  %565 = vperm.xlu0 %1915, %v2262_v53  }
 0x105   : > { %v2475_v47 = vpop.permute.xlu1 %385  ;;  %v2477_v50 = vpop.permute.xlu0 %382 }
 0x106   : > { %3383 = vst [vmem:[#allocation26_spill] sm:$0xff] %v2475_v47  ;;  %3384 = vst [vmem:[#allocation27_spill] sm:$0xff] %v2477_v50  ;;  %v726_v47 = vshrl.u32 %v210_v51, 7  ;;  %v3393_v50 = vld [vmem:[#allocation8_spill] sm:$0xff] }
 0x107   : > { %568 = vperm.xlu1 %1916, %v2273_v56   ;;  %571 = vperm.xlu0 %1915, %v3385_v49   ;;  %v2493_v56 = vand.u32 127, %v210_v51 }
 0x108   : > { %v1123_v41 = vsub.s32 3, %v726_v47  ;;  %v1519_v51 = vsub.s32 6, %v726_v47 }
 0x109   : > { %v2481_v43 = vpop.permute.xlu1 %391  ;;  %v2483_v52 = vpop.permute.xlu0 %388  ;;  %vm212_vm0 = vcmp.lt.s32.totalorder %v2493_v56, 64 }
 0x10a   : > { %3386 = vst [vmem:[#allocation5_spill] sm:$0xff] %v2481_v43  ;;  %3387 = vst [vmem:[#allocation28_spill] sm:$0xff] %v2483_v52  ;;  %v727_v52 = vsub.s32 0, %v726_v47 }
 0x10b   : > { %574 = vperm.xlu1 %1916, %v3388_v45   ;;  %577 = vperm.xlu0 %1915, %v3389_v48   ;;  %v209_v45 = vld [vmem:[%s3351_s1] sm:$0xff]  ;;  %v859_v48 = vsub.s32 1, %v726_v47 }
 0x10c   : > { %v2511_v42 = vrot.slane %v209_v45, %v1123_v41  ;;  %v2525_v41 = vrot.slane %v209_v45, %v1519_v51 }
 0x10d   : > { %v2487_v54 = vpop.permute.xlu1 %397  ;;  %v2489_v53 = vpop.permute.xlu0 %394  ;;  %v2507_v44 = vrot.slane %v209_v45, %v859_v48 }
 0x10e   : > { %3390 = vst [vmem:[#allocation7_spill] sm:$0xff] %v2487_v54  ;;  %3391 = vst [vmem:[#allocation6_spill] sm:$0xff] %v2489_v53  ;;  %v991_v54 = vsub.s32 2, %v726_v47  ;;  %v1255_v53 = vsub.s32 4, %v726_v47 }
 0x10f   : > { %580 = vperm.xlu1 %1916, %v3392_v46   ;;  %583 = vperm.xlu0 %1915, %v3393_v50   ;;  %v3396_v46 = vld [vmem:[#allocation10_spill] sm:$0xff]  ;;  %v1387_v50 = vsub.s32 5, %v726_v47 }
 0x110   : > { %v2509_v39 = vrot.slane %v209_v45, %v991_v54  ;;  %v2513_v37 = vrot.slane %v209_v45, %v1255_v53 }
 0x111   : > { %v2495_v49 = vpop.permute.xlu1 %403  ;;  %v2497_v43 = vpop.permute.xlu0 %400  ;;  %v2515_v35 = vrot.slane %v209_v45, %v1387_v50 }
 0x112   : > { %3394 = vst [vmem:[#allocation9_spill] sm:$0xff] %v2495_v49  ;;  %3395 = vst [vmem:[#allocation8_spill] sm:$0xff] %v2497_v43  ;;  %v1651_v49 = vsub.s32 7, %v726_v47  ;;  %v2505_v43 = vrot.slane %v209_v45, %v727_v52  ;;  %v3397_v52 = vld [vmem:[#allocation11_spill] sm:$0xff] }
 0x113   : > { %586 = vperm.xlu1 %1916, %v2297_v62   ;;  %589 = vperm.xlu0 %1915, %v3396_v46  }
 0x114   : > { %v2527_v54 = vrot.slane %v209_v45, %v1651_v49 }
 0x116   : > { %v410_v40 = vpop.permute.xlu1 %409  ;;  %v407_v62 = vpop.permute.xlu0 %406 }
 0x117   : > { %v598_v46 = vsel %vm212_vm0, %v2315_v60, %v410_v40  ;;  %v597_v47 = vsel %vm212_vm0, %v2309_v58, %v407_v62  ;;  %592 = vperm.xlu1 %1916, %v2305_v0   ;;  %595 = vperm.xlu0 %1915, %v3397_v52  }
 0x118   : > { %vm662_vm1 = vcmp.eq.s32.totalorder %v598_v46, 0  ;;  %vm794_vm2 = vcmp.eq.s32.totalorder %v598_v46, 1  ;;  %vm926_vm3 = vcmp.eq.s32.totalorder %v598_v46, 2  ;;  %vm1058_vm4 = vcmp.eq.s32.totalorder %v598_v46, 3 }
 0x119   : > { %v730_v53 = vsel %vm662_vm1, %v2505_v43, 0.0  ;;  %vm1190_vm5 = vcmp.eq.s32.totalorder %v598_v46, 4  ;;  %vm1322_vm6 = vcmp.eq.s32.totalorder %v598_v46, 5  ;;  %vm661_vm7 = vcmp.eq.s32.totalorder %v597_v47, 0 }
 0x11a   : > { %v862_v60 = vsel %vm794_vm2, %v2507_v44, %v730_v53  ;;  %vm793_vm8 = vcmp.eq.s32.totalorder %v597_v47, 1  ;;  %vm1454_vm9 = vcmp.eq.s32.totalorder %v598_v46, 6  ;;  %vm1586_vm10 = vcmp.eq.s32.totalorder %v598_v46, 7  ;;  %v413_v40 = vpop.permute.xlu1 %412  ;;  %v416_v51 = vpop.permute.xlu0 %415  ;;  %v3398_v53 = vld [vmem:[#allocation12_spill] sm:$0xff] }
 0x11b   : > { %v994_v58 = vsel %vm926_vm3, %v2509_v39, %v862_v60  ;;  %v729_v0 = vsel %vm661_vm7, %v2505_v43, 0.0  ;;  %vm925_vm11 = vcmp.eq.s32.totalorder %v597_v47, 2  ;;  %vm1057_vm12 = vcmp.eq.s32.totalorder %v597_v47, 3 }
 0x11c   : > { %v1126_v49 = vsel %vm1058_vm4, %v2511_v42, %v994_v58  ;;  %v861_v45 = vsel %vm793_vm8, %v2507_v44, %v729_v0  ;;  %vm1189_vm13 = vcmp.eq.s32.totalorder %v597_v47, 4  ;;  %vm1321_vm14 = vcmp.eq.s32.totalorder %v597_v47, 5 }
 0x11d   : > { %v1258_v48 = vsel %vm1190_vm5, %v2513_v37, %v1126_v49  ;;  %v993_v50 = vsel %vm925_vm11, %v2509_v39, %v861_v45  ;;  %vm1453_vm15 = vcmp.eq.s32.totalorder %v597_v47, 6  ;;  %v599_v60 = vsel %vm212_vm0, %v3398_v53, %v413_v40 }
 0x11e   : > { %v1390_v62 = vsel %vm1322_vm6, %v2515_v35, %v1258_v48  ;;  %v1125_v52 = vsel %vm1057_vm12, %v2511_v42, %v993_v50  ;;  %vm663_vm1 = vcmp.eq.s32.totalorder %v599_v60, 0  ;;  %vm795_vm2 = vcmp.eq.s32.totalorder %v599_v60, 1  ;;  %v3399_v50 = vld [vmem:[#allocation13_spill] sm:$0xff] }
 0x11f   : > { %v1522_v58 = vsel %vm1454_vm9, %v2525_v41, %v1390_v62  ;;  %v1257_v0 = vsel %vm1189_vm13, %v2513_v37, %v1125_v52  ;;  %v731_v48 = vsel %vm663_vm1, %v2505_v43, 0.0  ;;  %v600_v38 = vsel %vm212_vm0, %v3399_v50, %v416_v51 }
 0x120   : > { %v1654_v49 = vsel %vm1586_vm10, %v2527_v54, %v1522_v58  ;;  %v1389_v45 = vsel %vm1321_vm14, %v2515_v35, %v1257_v0  ;;  %vm1585_vm3 = vcmp.eq.s32.totalorder %v597_v47, 7  ;;  %v863_v62 = vsel %vm795_vm2, %v2507_v44, %v731_v48  ;;  %v419_v58 = vpop.permute.xlu1 %418 }
 0x121   : > { %1718 = vst [vmem:[%s2556_s30 + $0x8] sm:$0xff] %v1654_v49  ;;  %v1521_v40 = vsel %vm1453_vm15, %v2525_v41, %v1389_v45  ;;  %vm927_vm4 = vcmp.eq.s32.totalorder %v599_v60, 2  ;;  %vm1059_vm5 = vcmp.eq.s32.totalorder %v599_v60, 3  ;;  %vm1191_vm6 = vcmp.eq.s32.totalorder %v599_v60, 4  ;;  %v422_v45 = vpop.permute.xlu0 %421 }
 0x122   : > { %v1653_v46 = vsel %vm1585_vm3, %v2527_v54, %v1521_v40  ;;  %v995_v52 = vsel %vm927_vm4, %v2509_v39, %v863_v62  ;;  %vm1323_vm7 = vcmp.eq.s32.totalorder %v599_v60, 5  ;;  %vm664_vm8 = vcmp.eq.s32.totalorder %v600_v38, 0 }
 0x123   : > { %1717 = vst [vmem:[%s2556_s30] sm:$0xff] %v1653_v46  ;;  %v1127_v51 = vsel %vm1059_vm5, %v2511_v42, %v995_v52  ;;  %vm796_vm9 = vcmp.eq.s32.totalorder %v600_v38, 1  ;;  %vm1455_vm10 = vcmp.eq.s32.totalorder %v599_v60, 6  ;;  %vm1587_vm11 = vcmp.eq.s32.totalorder %v599_v60, 7 }
 0x124   : > { %v1259_v53 = vsel %vm1191_vm6, %v2513_v37, %v1127_v51  ;;  %v732_v47 = vsel %vm664_vm8, %v2505_v43, 0.0  ;;  %vm928_vm12 = vcmp.eq.s32.totalorder %v600_v38, 2  ;;  %vm1060_vm13 = vcmp.eq.s32.totalorder %v600_v38, 3 }
 0x125   : > { %v1391_v0 = vsel %vm1323_vm7, %v2515_v35, %v1259_v53  ;;  %v864_v49 = vsel %vm796_vm9, %v2507_v44, %v732_v47  ;;  %vm1192_vm14 = vcmp.eq.s32.totalorder %v600_v38, 4  ;;  %vm1324_vm15 = vcmp.eq.s32.totalorder %v600_v38, 5 }
 0x126   : > { %v1523_v48 = vsel %vm1455_vm10, %v2525_v41, %v1391_v0  ;;  %v996_v50 = vsel %vm928_vm12, %v2509_v39, %v864_v49  ;;  %vm1456_vm1 = vcmp.eq.s32.totalorder %v600_v38, 6  ;;  %v601_v62 = vsel %vm212_vm0, %v2321_v57, %v419_v58  ;;  %v425_v49 = vpop.permute.xlu1 %424 }
 0x127   : > { %v1655_v40 = vsel %vm1587_vm11, %v2527_v54, %v1523_v48  ;;  %v1128_v60 = vsel %vm1060_vm13, %v2511_v42, %v996_v50  ;;  %vm665_vm2 = vcmp.eq.s32.totalorder %v601_v62, 0  ;;  %vm797_vm3 = vcmp.eq.s32.totalorder %v601_v62, 1  ;;  %v428_v50 = vpop.permute.xlu0 %427 }
 0x128   : > { %1719 = vst [vmem:[%s2556_s30 + $0x10] sm:$0xff] %v1655_v40  ;;  %v1260_v46 = vsel %vm1192_vm14, %v2513_v37, %v1128_v60  ;;  %v602_v52 = vsel %vm212_vm0, %v2319_v61, %v422_v45  ;;  %vm1588_vm4 = vcmp.eq.s32.totalorder %v600_v38, 7  ;;  %v733_v53 = vsel %vm665_vm2, %v2505_v43, 0.0 }
 0x129   : > { %v1392_v51 = vsel %vm1324_vm15, %v2515_v35, %v1260_v46  ;;  %vm929_vm5 = vcmp.eq.s32.totalorder %v601_v62, 2  ;;  %v865_v57 = vsel %vm797_vm3, %v2507_v44, %v733_v53  ;;  %vm1061_vm6 = vcmp.eq.s32.totalorder %v601_v62, 3 }
 0x12a   : > { %v1524_v47 = vsel %vm1456_vm1, %v2525_v41, %v1392_v51  ;;  %vm1193_vm7 = vcmp.eq.s32.totalorder %v601_v62, 4  ;;  %v997_v0 = vsel %vm929_vm5, %v2509_v39, %v865_v57  ;;  %vm1325_vm8 = vcmp.eq.s32.totalorder %v601_v62, 5 }
 0x12b   : > { %v1656_v58 = vsel %vm1588_vm4, %v2527_v54, %v1524_v47  ;;  %vm666_vm9 = vcmp.eq.s32.totalorder %v602_v52, 0  ;;  %v1129_v61 = vsel %vm1061_vm6, %v2511_v42, %v997_v0  ;;  %vm1457_vm10 = vcmp.eq.s32.totalorder %v601_v62, 6 }
 0x12c   : > { %1720 = vst [vmem:[%s2556_s30 + $0x18] sm:$0xff] %v1656_v58  ;;  %v734_v38 = vsel %vm666_vm9, %v2505_v43, 0.0  ;;  %vm798_vm11 = vcmp.eq.s32.totalorder %v602_v52, 1  ;;  %v1261_v45 = vsel %vm1193_vm7, %v2513_v37, %v1129_v61  ;;  %vm1589_vm12 = vcmp.eq.s32.totalorder %v601_v62, 7 }
 0x12d   : > { %v866_v48 = vsel %vm798_vm11, %v2507_v44, %v734_v38  ;;  %vm930_vm13 = vcmp.eq.s32.totalorder %v602_v52, 2  ;;  %v1393_v40 = vsel %vm1325_vm8, %v2515_v35, %v1261_v45  ;;  %vm1062_vm14 = vcmp.eq.s32.totalorder %v602_v52, 3  ;;  %v434_v45 = vpop.permute.xlu0 %433 }
 0x12e   : > { %v998_v60 = vsel %vm930_vm13, %v2509_v39, %v866_v48  ;;  %vm1194_vm15 = vcmp.eq.s32.totalorder %v602_v52, 4  ;;  %v1525_v46 = vsel %vm1457_vm10, %v2525_v41, %v1393_v40  ;;  %vm1326_vm1 = vcmp.eq.s32.totalorder %v602_v52, 5 }
 0x12f   : > { %v1130_v51 = vsel %vm1062_vm14, %v2511_v42, %v998_v60  ;;  %v603_v62 = vsel %vm212_vm0, %v2327_v59, %v425_v49  ;;  %v1657_v53 = vsel %vm1589_vm12, %v2527_v54, %v1525_v46  ;;  %vm1458_vm4 = vcmp.eq.s32.totalorder %v602_v52, 6  ;;  %v431_v59 = vpop.permute.xlu1 %430 }
 0x130   : > { %v1262_v47 = vsel %vm1194_vm15, %v2513_v37, %v1130_v51  ;;  %vm667_vm2 = vcmp.eq.s32.totalorder %v603_v62, 0  ;;  %vm799_vm3 = vcmp.eq.s32.totalorder %v603_v62, 1  ;;  %1721 = vst [vmem:[%s2556_s30 + $0x20] sm:$0xff] %v1657_v53  ;;  %vm1590_vm5 = vcmp.eq.s32.totalorder %v602_v52, 7 }
 0x131   : > { %v1394_v57 = vsel %vm1326_vm1, %v2515_v35, %v1262_v47  ;;  %v735_v58 = vsel %vm667_vm2, %v2505_v43, 0.0  ;;  %vm931_vm6 = vcmp.eq.s32.totalorder %v603_v62, 2  ;;  %vm1063_vm7 = vcmp.eq.s32.totalorder %v603_v62, 3 }
 0x132   : > { %v1526_v0 = vsel %vm1458_vm4, %v2525_v41, %v1394_v57  ;;  %v867_v61 = vsel %vm799_vm3, %v2507_v44, %v735_v58  ;;  %vm1195_vm8 = vcmp.eq.s32.totalorder %v603_v62, 4  ;;  %vm1327_vm9 = vcmp.eq.s32.totalorder %v603_v62, 5 }
 0x133   : > { %v1658_v38 = vsel %vm1590_vm5, %v2527_v54, %v1526_v0  ;;  %v999_v49 = vsel %vm931_vm6, %v2509_v39, %v867_v61  ;;  %vm1459_vm10 = vcmp.eq.s32.totalorder %v603_v62, 6  ;;  %vm1591_vm11 = vcmp.eq.s32.totalorder %v603_v62, 7  ;;  %v437_v0 = vpop.permute.xlu1 %436 }
 0x134   : > { %1722 = vst [vmem:[%s2556_s30 + $0x28] sm:$0xff] %v1658_v38  ;;  %v1131_v48 = vsel %vm1063_vm7, %v2511_v42, %v999_v49  ;;  %v604_v52 = vsel %vm212_vm0, %v2325_v63, %v428_v50  ;;  %v605_v60 = vsel %vm212_vm0, %v2333_v4, %v431_v59  ;;  %v606_v62 = vsel %vm212_vm0, %v2331_v55, %v434_v45 }
 0x135   : > { %v1263_v40 = vsel %vm1195_vm8, %v2513_v37, %v1131_v48  ;;  %vm668_vm12 = vcmp.eq.s32.totalorder %v604_v52, 0  ;;  %vm800_vm13 = vcmp.eq.s32.totalorder %v604_v52, 1  ;;  %vm932_vm14 = vcmp.eq.s32.totalorder %v604_v52, 2 }
 0x136   : > { %v1395_v46 = vsel %vm1327_vm9, %v2515_v35, %v1263_v40  ;;  %v736_v51 = vsel %vm668_vm12, %v2505_v43, 0.0  ;;  %vm1064_vm15 = vcmp.eq.s32.totalorder %v604_v52, 3  ;;  %vm1196_vm1 = vcmp.eq.s32.totalorder %v604_v52, 4 }
 0x137   : > { %v1527_v63 = vsel %vm1459_vm10, %v2525_v41, %v1395_v46  ;;  %v868_v50 = vsel %vm800_vm13, %v2507_v44, %v736_v51  ;;  %vm1328_vm2 = vcmp.eq.s32.totalorder %v604_v52, 5  ;;  %vm669_vm3 = vcmp.eq.s32.totalorder %v605_v60, 0 }
 0x138   : > { %v1659_v53 = vsel %vm1591_vm11, %v2527_v54, %v1527_v63  ;;  %v1000_v47 = vsel %vm932_vm14, %v2509_v39, %v868_v50  ;;  %vm1460_vm4 = vcmp.eq.s32.totalorder %v604_v52, 6  ;;  %v737_v57 = vsel %vm669_vm3, %v2505_v43, 0.0  ;;  %v440_v50 = vpop.permute.xlu0 %439 }
 0x139   : > { %1723 = vst [vmem:[%s2556_s30 + $0x30] sm:$0xff] %v1659_v53  ;;  %v1132_v4 = vsel %vm1064_vm15, %v2511_v42, %v1000_v47  ;;  %vm801_vm5 = vcmp.eq.s32.totalorder %v605_v60, 1  ;;  %vm1592_vm6 = vcmp.eq.s32.totalorder %v604_v52, 7  ;;  %vm933_vm7 = vcmp.eq.s32.totalorder %v605_v60, 2 }
 0x13a   : > { %v1264_v55 = vsel %vm1196_vm1, %v2513_v37, %v1132_v4  ;;  %v869_v58 = vsel %vm801_vm5, %v2507_v44, %v737_v57  ;;  %vm1065_vm8 = vcmp.eq.s32.totalorder %v605_v60, 3  ;;  %vm1197_vm9 = vcmp.eq.s32.totalorder %v605_v60, 4  ;;  %v443_v4 = vpop.permute.xlu1 %442 }
 0x13b   : > { %v1396_v61 = vsel %vm1328_vm2, %v2515_v35, %v1264_v55  ;;  %v1001_v59 = vsel %vm933_vm7, %v2509_v39, %v869_v58  ;;  %vm1329_vm10 = vcmp.eq.s32.totalorder %v605_v60, 5  ;;  %vm670_vm11 = vcmp.eq.s32.totalorder %v606_v62, 0 }
 0x13c   : > { %v1528_v38 = vsel %vm1460_vm4, %v2525_v41, %v1396_v61  ;;  %v1133_v49 = vsel %vm1065_vm8, %v2511_v42, %v1001_v59  ;;  %v738_v52 = vsel %vm670_vm11, %v2505_v43, 0.0  ;;  %vm802_vm12 = vcmp.eq.s32.totalorder %v606_v62, 1 }
 0x13d   : > { %v1660_v45 = vsel %vm1592_vm6, %v2527_v54, %v1528_v38  ;;  %v1265_v48 = vsel %vm1197_vm9, %v2513_v37, %v1133_v49  ;;  %vm1461_vm13 = vcmp.eq.s32.totalorder %v605_v60, 6  ;;  %v870_v46 = vsel %vm802_vm12, %v2507_v44, %v738_v52 }
 0x13e   : > { %1724 = vst [vmem:[%s2556_s30 + $0x38] sm:$0xff] %v1660_v45  ;;  %v1397_v40 = vsel %vm1329_vm10, %v2515_v35, %v1265_v48  ;;  %vm934_vm14 = vcmp.eq.s32.totalorder %v606_v62, 2  ;;  %vm1593_vm15 = vcmp.eq.s32.totalorder %v605_v60, 7  ;;  %vm1066_vm1 = vcmp.eq.s32.totalorder %v606_v62, 3 }
 0x13f   : > { %v1529_v51 = vsel %vm1461_vm13, %v2525_v41, %v1397_v40  ;;  %v1002_v63 = vsel %vm934_vm14, %v2509_v39, %v870_v46  ;;  %vm1198_vm2 = vcmp.eq.s32.totalorder %v606_v62, 4  ;;  %vm1330_vm3 = vcmp.eq.s32.totalorder %v606_v62, 5 }
 0x140   : > { %v1661_v53 = vsel %vm1593_vm15, %v2527_v54, %v1529_v51  ;;  %v1134_v47 = vsel %vm1066_vm1, %v2511_v42, %v1002_v63  ;;  %vm1462_vm4 = vcmp.eq.s32.totalorder %v606_v62, 6  ;;  %vm1594_vm5 = vcmp.eq.s32.totalorder %v606_v62, 7 }
 0x141   : > { %1725 = vst [vmem:[%s2556_s30 + $0x40] sm:$0xff] %v1661_v53  ;;  %v1266_v57 = vsel %vm1198_vm2, %v2513_v37, %v1134_v47  ;;  %v607_v60 = vsel %vm212_vm0, %v2339_v1, %v437_v0  ;;  %v608_v58 = vsel %vm212_vm0, %v2337_v2, %v440_v50  ;;  %v609_v62 = vsel %vm212_vm0, %v2345_v6, %v443_v4  ;;  %v446_v53 = vpop.permute.xlu0 %445 }
 0x142   : > { %v1398_v55 = vsel %vm1330_vm3, %v2515_v35, %v1266_v57  ;;  %vm671_vm6 = vcmp.eq.s32.totalorder %v607_v60, 0  ;;  %vm803_vm7 = vcmp.eq.s32.totalorder %v607_v60, 1  ;;  %vm935_vm8 = vcmp.eq.s32.totalorder %v607_v60, 2 }
 0x143   : > { %v1530_v61 = vsel %vm1462_vm4, %v2525_v41, %v1398_v55  ;;  %v739_v59 = vsel %vm671_vm6, %v2505_v43, 0.0  ;;  %vm1067_vm9 = vcmp.eq.s32.totalorder %v607_v60, 3  ;;  %vm1199_vm10 = vcmp.eq.s32.totalorder %v607_v60, 4 }
 0x144   : > { %v1662_v38 = vsel %vm1594_vm5, %v2527_v54, %v1530_v61  ;;  %v871_v1 = vsel %vm803_vm7, %v2507_v44, %v739_v59  ;;  %vm1331_vm11 = vcmp.eq.s32.totalorder %v607_v60, 5  ;;  %vm672_vm12 = vcmp.eq.s32.totalorder %v608_v58, 0 }
 0x145   : > { %1726 = vst [vmem:[%s2556_s30 + $0x48] sm:$0xff] %v1662_v38  ;;  %v1003_v0 = vsel %vm935_vm8, %v2509_v39, %v871_v1  ;;  %vm804_vm13 = vcmp.eq.s32.totalorder %v608_v58, 1  ;;  %vm1463_vm14 = vcmp.eq.s32.totalorder %v607_v60, 6  ;;  %vm1595_vm15 = vcmp.eq.s32.totalorder %v607_v60, 7  ;;  %v449_v38 = vpop.permute.xlu1 %448 }
 0x146   : > { %v1135_v2 = vsel %vm1067_vm9, %v2511_v42, %v1003_v0  ;;  %v740_v49 = vsel %vm672_vm12, %v2505_v43, 0.0  ;;  %vm936_vm1 = vcmp.eq.s32.totalorder %v608_v58, 2  ;;  %vm1068_vm2 = vcmp.eq.s32.totalorder %v608_v58, 3 }
 0x147   : > { %v1267_v6 = vsel %vm1199_vm10, %v2513_v37, %v1135_v2  ;;  %v872_v45 = vsel %vm804_vm13, %v2507_v44, %v740_v49  ;;  %vm1200_vm3 = vcmp.eq.s32.totalorder %v608_v58, 4  ;;  %vm1332_vm4 = vcmp.eq.s32.totalorder %v608_v58, 5 }
 0x148   : > { %v1399_v48 = vsel %vm1331_vm11, %v2515_v35, %v1267_v6  ;;  %v1004_v52 = vsel %vm936_vm1, %v2509_v39, %v872_v45  ;;  %vm673_vm5 = vcmp.eq.s32.totalorder %v609_v62, 0  ;;  %vm805_vm6 = vcmp.eq.s32.totalorder %v609_v62, 1 }
 0x149   : > { %v1531_v40 = vsel %vm1463_vm14, %v2525_v41, %v1399_v48  ;;  %v1136_v46 = vsel %vm1068_vm2, %v2511_v42, %v1004_v52  ;;  %vm1464_vm7 = vcmp.eq.s32.totalorder %v608_v58, 6  ;;  %v741_v50 = vsel %vm673_vm5, %v2505_v43, 0.0  ;;  %v452_v48 = vpop.permute.xlu0 %451 }
 0x14a   : > { %v1663_v51 = vsel %vm1595_vm15, %v2527_v54, %v1531_v40  ;;  %v1268_v63 = vsel %vm1200_vm3, %v2513_v37, %v1136_v46  ;;  %vm1596_vm8 = vcmp.eq.s32.totalorder %v608_v58, 7  ;;  %v873_v4 = vsel %vm805_vm6, %v2507_v44, %v741_v50 }
 0x14b   : > { %1727 = vst [vmem:[%s2556_s30 + $0x50] sm:$0xff] %v1663_v51  ;;  %v1400_v47 = vsel %vm1332_vm4, %v2515_v35, %v1268_v63  ;;  %vm937_vm9 = vcmp.eq.s32.totalorder %v609_v62, 2  ;;  %vm1069_vm10 = vcmp.eq.s32.totalorder %v609_v62, 3  ;;  %vm1201_vm11 = vcmp.eq.s32.totalorder %v609_v62, 4 }
 0x14c   : > { %v1532_v57 = vsel %vm1464_vm7, %v2525_v41, %v1400_v47  ;;  %v1005_v60 = vsel %vm937_vm9, %v2509_v39, %v873_v4  ;;  %vm1333_vm12 = vcmp.eq.s32.totalorder %v609_v62, 5  ;;  %v610_v59 = vsel %vm212_vm0, %v2343_v3, %v446_v53 }
 0x14d   : > { %v1664_v55 = vsel %vm1596_vm8, %v2527_v54, %v1532_v57  ;;  %v1137_v61 = vsel %vm1069_vm10, %v2511_v42, %v1005_v60  ;;  %vm1465_vm13 = vcmp.eq.s32.totalorder %v609_v62, 6  ;;  %vm674_vm14 = vcmp.eq.s32.totalorder %v610_v59, 0  ;;  %v455_v60 = vpop.permute.xlu1 %454 }
 0x14e   : > { %1728 = vst [vmem:[%s2556_s30 + $0x58] sm:$0xff] %v1664_v55  ;;  %v1269_v58 = vsel %vm1201_vm11, %v2513_v37, %v1137_v61  ;;  %vm806_vm15 = vcmp.eq.s32.totalorder %v610_v59, 1  ;;  %vm1597_vm1 = vcmp.eq.s32.totalorder %v609_v62, 7  ;;  %v742_v0 = vsel %vm674_vm14, %v2505_v43, 0.0 }
 0x14f   : > { %v1401_v1 = vsel %vm1333_vm12, %v2515_v35, %v1269_v58  ;;  %vm938_vm2 = vcmp.eq.s32.totalorder %v610_v59, 2  ;;  %v874_v49 = vsel %vm806_vm15, %v2507_v44, %v742_v0  ;;  %vm1070_vm3 = vcmp.eq.s32.totalorder %v610_v59, 3 }
 0x150   : > { %v1533_v2 = vsel %vm1465_vm13, %v2525_v41, %v1401_v1  ;;  %vm1202_vm4 = vcmp.eq.s32.totalorder %v610_v59, 4  ;;  %v1006_v6 = vsel %vm938_vm2, %v2509_v39, %v874_v49  ;;  %vm1334_vm5 = vcmp.eq.s32.totalorder %v610_v59, 5 }
 0x151   : > { %v1665_v3 = vsel %vm1597_vm1, %v2527_v54, %v1533_v2  ;;  %v611_v45 = vsel %vm212_vm0, %v2351_v8, %v449_v38  ;;  %v1138_v62 = vsel %vm1070_vm3, %v2511_v42, %v1006_v6  ;;  %vm1466_vm6 = vcmp.eq.s32.totalorder %v610_v59, 6 }
 0x152   : > { %1729 = vst [vmem:[%s2556_s30 + $0x60] sm:$0xff] %v1665_v3  ;;  %vm675_vm7 = vcmp.eq.s32.totalorder %v611_v45, 0  ;;  %vm807_vm8 = vcmp.eq.s32.totalorder %v611_v45, 1  ;;  %v1270_v52 = vsel %vm1202_vm4, %v2513_v37, %v1138_v62  ;;  %vm1598_vm9 = vcmp.eq.s32.totalorder %v610_v59, 7 }
 0x153   : > { %v743_v40 = vsel %vm675_vm7, %v2505_v43, 0.0  ;;  %vm939_vm10 = vcmp.eq.s32.totalorder %v611_v45, 2  ;;  %v1402_v46 = vsel %vm1334_vm5, %v2515_v35, %v1270_v52  ;;  %vm1071_vm11 = vcmp.eq.s32.totalorder %v611_v45, 3 }
 0x154   : > { %v875_v51 = vsel %vm807_vm8, %v2507_v44, %v743_v40  ;;  %vm1203_vm12 = vcmp.eq.s32.totalorder %v611_v45, 4  ;;  %v1534_v8 = vsel %vm1466_vm6, %v2525_v41, %v1402_v46  ;;  %vm1335_vm13 = vcmp.eq.s32.totalorder %v611_v45, 5  ;;  %v461_v40 = vpop.permute.xlu1 %460 }
 0x155   : > { %v1007_v63 = vsel %vm939_vm10, %v2509_v39, %v875_v51  ;;  %v612_v50 = vsel %vm212_vm0, %v2349_v5, %v452_v48  ;;  %v1666_v53 = vsel %vm1598_vm9, %v2527_v54, %v1534_v8  ;;  %vm1467_vm1 = vcmp.eq.s32.totalorder %v611_v45, 6  ;;  %v458_v5 = vpop.permute.xlu0 %457 }
 0x156   : > { %v1139_v47 = vsel %vm1071_vm11, %v2511_v42, %v1007_v63  ;;  %vm676_vm14 = vcmp.eq.s32.totalorder %v612_v50, 0  ;;  %vm808_vm15 = vcmp.eq.s32.totalorder %v612_v50, 1  ;;  %1730 = vst [vmem:[%s2556_s30 + $0x68] sm:$0xff] %v1666_v53  ;;  %vm1599_vm2 = vcmp.eq.s32.totalorder %v611_v45, 7 }
 0x157   : > { %v1271_v4 = vsel %vm1203_vm12, %v2513_v37, %v1139_v47  ;;  %v744_v57 = vsel %vm676_vm14, %v2505_v43, 0.0  ;;  %vm940_vm3 = vcmp.eq.s32.totalorder %v612_v50, 2  ;;  %vm1072_vm4 = vcmp.eq.s32.totalorder %v612_v50, 3 }
 0x158   : > { %v1403_v55 = vsel %vm1335_vm13, %v2515_v35, %v1271_v4  ;;  %v876_v61 = vsel %vm808_vm15, %v2507_v44, %v744_v57  ;;  %vm1204_vm5 = vcmp.eq.s32.totalorder %v612_v50, 4  ;;  %vm1336_vm6 = vcmp.eq.s32.totalorder %v612_v50, 5 }
 0x159   : > { %v1535_v59 = vsel %vm1467_vm1, %v2525_v41, %v1403_v55  ;;  %v1008_v58 = vsel %vm940_vm3, %v2509_v39, %v876_v61  ;;  %vm1468_vm7 = vcmp.eq.s32.totalorder %v612_v50, 6  ;;  %v613_v0 = vsel %vm212_vm0, %v2357_v10, %v455_v60  ;;  %v464_v8 = vpop.permute.xlu0 %463 }
 0x15a   : > { %v1667_v38 = vsel %vm1599_vm2, %v2527_v54, %v1535_v59  ;;  %v1140_v1 = vsel %vm1072_vm4, %v2511_v42, %v1008_v58  ;;  %vm677_vm8 = vcmp.eq.s32.totalorder %v613_v0, 0  ;;  %vm809_vm9 = vcmp.eq.s32.totalorder %v613_v0, 1 }
 0x15b   : > { %1731 = vst [vmem:[%s2556_s30 + $0x70] sm:$0xff] %v1667_v38  ;;  %v1272_v2 = vsel %vm1204_vm5, %v2513_v37, %v1140_v1  ;;  %v614_v49 = vsel %vm212_vm0, %v2355_v7, %v458_v5  ;;  %vm1600_vm10 = vcmp.eq.s32.totalorder %v612_v50, 7  ;;  %v745_v6 = vsel %vm677_vm8, %v2505_v43, 0.0 }
 0x15c   : > { %v1404_v3 = vsel %vm1336_vm6, %v2515_v35, %v1272_v2  ;;  %vm941_vm11 = vcmp.eq.s32.totalorder %v613_v0, 2  ;;  %v877_v10 = vsel %vm809_vm9, %v2507_v44, %v745_v6  ;;  %vm1073_vm12 = vcmp.eq.s32.totalorder %v613_v0, 3 }
 0x15d   : > { %v1536_v45 = vsel %vm1468_vm7, %v2525_v41, %v1404_v3  ;;  %vm1205_vm13 = vcmp.eq.s32.totalorder %v613_v0, 4  ;;  %v1009_v48 = vsel %vm941_vm11, %v2509_v39, %v877_v10  ;;  %vm1337_vm14 = vcmp.eq.s32.totalorder %v613_v0, 5  ;;  %v470_v1 = vpop.permute.xlu0 %469 }
 0x15e   : > { %v1668_v62 = vsel %vm1600_vm10, %v2527_v54, %v1536_v45  ;;  %vm678_vm15 = vcmp.eq.s32.totalorder %v614_v49, 0  ;;  %v1141_v7 = vsel %vm1073_vm12, %v2511_v42, %v1009_v48  ;;  %vm1469_vm1 = vcmp.eq.s32.totalorder %v613_v0, 6 }
 0x15f   : > { %1732 = vst [vmem:[%s2556_s30 + $0x78] sm:$0xff] %v1668_v62  ;;  %v746_v52 = vsel %vm678_vm15, %v2505_v43, 0.0  ;;  %vm810_vm2 = vcmp.eq.s32.totalorder %v614_v49, 1  ;;  %v1273_v46 = vsel %vm1205_vm13, %v2513_v37, %v1141_v7  ;;  %vm1601_vm3 = vcmp.eq.s32.totalorder %v613_v0, 7 }
 0x160   : > { %v878_v51 = vsel %vm810_vm2, %v2507_v44, %v746_v52  ;;  %vm942_vm4 = vcmp.eq.s32.totalorder %v614_v49, 2  ;;  %v1405_v63 = vsel %vm1337_vm14, %v2515_v35, %v1273_v46  ;;  %vm1074_vm5 = vcmp.eq.s32.totalorder %v614_v49, 3 }
 0x161   : > { %v1010_v50 = vsel %vm942_vm4, %v2509_v39, %v878_v51  ;;  %vm1206_vm6 = vcmp.eq.s32.totalorder %v614_v49, 4  ;;  %v1537_v53 = vsel %vm1469_vm1, %v2525_v41, %v1405_v63  ;;  %vm1338_vm7 = vcmp.eq.s32.totalorder %v614_v49, 5 }
 0x162   : > { %v1142_v47 = vsel %vm1074_vm5, %v2511_v42, %v1010_v50  ;;  %v615_v4 = vsel %vm212_vm0, %v2363_v12, %v461_v40  ;;  %v1669_v57 = vsel %vm1601_vm3, %v2527_v54, %v1537_v53  ;;  %vm1470_vm10 = vcmp.eq.s32.totalorder %v614_v49, 6  ;;  %v467_v12 = vpop.permute.xlu1 %466 }
 0x163   : > { %v1274_v60 = vsel %vm1206_vm6, %v2513_v37, %v1142_v47  ;;  %vm679_vm8 = vcmp.eq.s32.totalorder %v615_v4, 0  ;;  %vm811_vm9 = vcmp.eq.s32.totalorder %v615_v4, 1  ;;  %1733 = vst [vmem:[%s2556_s30 + $0x80] sm:$0xff] %v1669_v57  ;;  %vm1602_vm11 = vcmp.eq.s32.totalorder %v614_v49, 7 }
 0x164   : > { %v1406_v55 = vsel %vm1338_vm7, %v2515_v35, %v1274_v60  ;;  %v747_v61 = vsel %vm679_vm8, %v2505_v43, 0.0  ;;  %vm943_vm12 = vcmp.eq.s32.totalorder %v615_v4, 2  ;;  %vm1075_vm13 = vcmp.eq.s32.totalorder %v615_v4, 3 }
 0x165   : > { %v1538_v5 = vsel %vm1470_vm10, %v2525_v41, %v1406_v55  ;;  %v879_v59 = vsel %vm811_vm9, %v2507_v44, %v747_v61  ;;  %vm1207_vm14 = vcmp.eq.s32.totalorder %v615_v4, 4  ;;  %vm1339_vm15 = vcmp.eq.s32.totalorder %v615_v4, 5 }
 0x166   : > { %v1670_v58 = vsel %vm1602_vm11, %v2527_v54, %v1538_v5  ;;  %v1011_v38 = vsel %vm943_vm12, %v2509_v39, %v879_v59  ;;  %vm1471_vm1 = vcmp.eq.s32.totalorder %v615_v4, 6  ;;  %vm1603_vm2 = vcmp.eq.s32.totalorder %v615_v4, 7  ;;  %v473_v46 = vpop.permute.xlu1 %472  ;;  %v476_v5 = vpop.permute.xlu0 %475 }
 0x167   : > { %1734 = vst [vmem:[%s2556_s30 + $0x88] sm:$0xff] %v1670_v58  ;;  %v1143_v0 = vsel %vm1075_vm13, %v2511_v42, %v1011_v38  ;;  %v616_v2 = vsel %vm212_vm0, %v2361_v9, %v464_v8  ;;  %v617_v3 = vsel %vm212_vm0, %v2369_v14, %v467_v12  ;;  %v618_v10 = vsel %vm212_vm0, %v2367_v11, %v470_v1 }
 0x168   : > { %v1275_v49 = vsel %vm1207_vm14, %v2513_v37, %v1143_v0  ;;  %vm680_vm3 = vcmp.eq.s32.totalorder %v616_v2, 0  ;;  %vm812_vm4 = vcmp.eq.s32.totalorder %v616_v2, 1  ;;  %vm944_vm5 = vcmp.eq.s32.totalorder %v616_v2, 2 }
 0x169   : > { %v1407_v6 = vsel %vm1339_vm15, %v2515_v35, %v1275_v49  ;;  %v748_v45 = vsel %vm680_vm3, %v2505_v43, 0.0  ;;  %vm1076_vm6 = vcmp.eq.s32.totalorder %v616_v2, 3  ;;  %vm1208_vm7 = vcmp.eq.s32.totalorder %v616_v2, 4 }
 0x16a   : > { %v1539_v9 = vsel %vm1471_vm1, %v2525_v41, %v1407_v6  ;;  %v880_v62 = vsel %vm812_vm4, %v2507_v44, %v748_v45  ;;  %vm1340_vm8 = vcmp.eq.s32.totalorder %v616_v2, 5  ;;  %vm681_vm9 = vcmp.eq.s32.totalorder %v617_v3, 0  ;;  %v479_v58 = vpop.permute.xlu1 %478 }
 0x16b   : > { %v1671_v48 = vsel %vm1603_vm2, %v2527_v54, %v1539_v9  ;;  %v1012_v7 = vsel %vm944_vm5, %v2509_v39, %v880_v62  ;;  %vm1472_vm10 = vcmp.eq.s32.totalorder %v616_v2, 6  ;;  %v749_v52 = vsel %vm681_vm9, %v2505_v43, 0.0 }
 0x16c   : > { %1735 = vst [vmem:[%s2556_s30 + $0x90] sm:$0xff] %v1671_v48  ;;  %v1144_v14 = vsel %vm1076_vm6, %v2511_v42, %v1012_v7  ;;  %vm813_vm11 = vcmp.eq.s32.totalorder %v617_v3, 1  ;;  %vm1604_vm12 = vcmp.eq.s32.totalorder %v616_v2, 7  ;;  %vm945_vm13 = vcmp.eq.s32.totalorder %v617_v3, 2 }
 0x16d   : > { %v1276_v11 = vsel %vm1208_vm7, %v2513_v37, %v1144_v14  ;;  %v881_v40 = vsel %vm813_vm11, %v2507_v44, %v749_v52  ;;  %vm1077_vm14 = vcmp.eq.s32.totalorder %v617_v3, 3  ;;  %vm1209_vm15 = vcmp.eq.s32.totalorder %v617_v3, 4 }
 0x16e   : > { %v1408_v51 = vsel %vm1340_vm8, %v2515_v35, %v1276_v11  ;;  %v1013_v8 = vsel %vm945_vm13, %v2509_v39, %v881_v40  ;;  %vm1341_vm1 = vcmp.eq.s32.totalorder %v617_v3, 5  ;;  %vm682_vm2 = vcmp.eq.s32.totalorder %v618_v10, 0 }
 0x16f   : > { %v1540_v63 = vsel %vm1472_vm10, %v2525_v41, %v1408_v51  ;;  %v1145_v50 = vsel %vm1077_vm14, %v2511_v42, %v1013_v8  ;;  %v750_v4 = vsel %vm682_vm2, %v2505_v43, 0.0  ;;  %vm814_vm3 = vcmp.eq.s32.totalorder %v618_v10, 1  ;;  %v482_v51 = vpop.permute.xlu0 %481 }
 0x170   : > { %v1672_v53 = vsel %vm1604_vm12, %v2527_v54, %v1540_v63  ;;  %v1277_v47 = vsel %vm1209_vm15, %v2513_v37, %v1145_v50  ;;  %vm1473_vm4 = vcmp.eq.s32.totalorder %v617_v3, 6  ;;  %v882_v60 = vsel %vm814_vm3, %v2507_v44, %v750_v4 }
 0x171   : > { %1736 = vst [vmem:[%s2556_s30 + $0x98] sm:$0xff] %v1672_v53  ;;  %v1409_v57 = vsel %vm1341_vm1, %v2515_v35, %v1277_v47  ;;  %vm946_vm5 = vcmp.eq.s32.totalorder %v618_v10, 2  ;;  %vm1605_vm6 = vcmp.eq.s32.totalorder %v617_v3, 7  ;;  %vm1078_vm7 = vcmp.eq.s32.totalorder %v618_v10, 3 }
 0x172   : > { %v1541_v55 = vsel %vm1473_vm4, %v2525_v41, %v1409_v57  ;;  %v1014_v61 = vsel %vm946_vm5, %v2509_v39, %v882_v60  ;;  %vm1210_vm8 = vcmp.eq.s32.totalorder %v618_v10, 4  ;;  %vm1342_vm9 = vcmp.eq.s32.totalorder %v618_v10, 5 }
 0x173   : > { %v1673_v59 = vsel %vm1605_vm6, %v2527_v54, %v1541_v55  ;;  %v1146_v12 = vsel %vm1078_vm7, %v2511_v42, %v1014_v61  ;;  %vm1474_vm10 = vcmp.eq.s32.totalorder %v618_v10, 6  ;;  %vm1606_vm11 = vcmp.eq.s32.totalorder %v618_v10, 7  ;;  %v485_v55 = vpop.permute.xlu1 %484 }
 0x174   : > { %1737 = vst [vmem:[%s2556_s30 + $0xa0] sm:$0xff] %v1673_v59  ;;  %v1278_v38 = vsel %vm1210_vm8, %v2513_v37, %v1146_v12  ;;  %v619_v1 = vsel %vm212_vm0, %v2375_v16, %v473_v46  ;;  %v620_v2 = vsel %vm212_vm0, %v2373_v13, %v476_v5  ;;  %v621_v6 = vsel %vm212_vm0, %v2381_v18, %v479_v58 }
 0x175   : > { %v1410_v0 = vsel %vm1342_vm9, %v2515_v35, %v1278_v38  ;;  %vm683_vm12 = vcmp.eq.s32.totalorder %v619_v1, 0  ;;  %vm815_vm13 = vcmp.eq.s32.totalorder %v619_v1, 1  ;;  %vm947_vm14 = vcmp.eq.s32.totalorder %v619_v1, 2 }
 0x176   : > { %v1542_v49 = vsel %vm1474_vm10, %v2525_v41, %v1410_v0  ;;  %v751_v3 = vsel %vm683_vm12, %v2505_v43, 0.0  ;;  %vm1079_vm15 = vcmp.eq.s32.totalorder %v619_v1, 3  ;;  %vm1211_vm1 = vcmp.eq.s32.totalorder %v619_v1, 4  ;;  %v488_v0 = vpop.permute.xlu0 %487 }
 0x177   : > { %v1674_v45 = vsel %vm1606_vm11, %v2527_v54, %v1542_v49  ;;  %v883_v16 = vsel %vm815_vm13, %v2507_v44, %v751_v3  ;;  %vm1343_vm2 = vcmp.eq.s32.totalorder %v619_v1, 5  ;;  %vm684_vm3 = vcmp.eq.s32.totalorder %v620_v2, 0 }
 0x178   : > { %1738 = vst [vmem:[%s2556_s30 + $0xa8] sm:$0xff] %v1674_v45  ;;  %v1015_v10 = vsel %vm947_vm14, %v2509_v39, %v883_v16  ;;  %vm816_vm4 = vcmp.eq.s32.totalorder %v620_v2, 1  ;;  %vm1475_vm5 = vcmp.eq.s32.totalorder %v619_v1, 6  ;;  %vm1607_vm6 = vcmp.eq.s32.totalorder %v619_v1, 7 }
 0x179   : > { %v1147_v13 = vsel %vm1079_vm15, %v2511_v42, %v1015_v10  ;;  %v752_v9 = vsel %vm684_vm3, %v2505_v43, 0.0  ;;  %vm948_vm7 = vcmp.eq.s32.totalorder %v620_v2, 2  ;;  %vm1080_vm8 = vcmp.eq.s32.totalorder %v620_v2, 3 }
 0x17a   : > { %v1279_v18 = vsel %vm1211_vm1, %v2513_v37, %v1147_v13  ;;  %v884_v62 = vsel %vm816_vm4, %v2507_v44, %v752_v9  ;;  %vm1212_vm9 = vcmp.eq.s32.totalorder %v620_v2, 4  ;;  %vm1344_vm10 = vcmp.eq.s32.totalorder %v620_v2, 5 }
 0x17b   : > { %v1411_v48 = vsel %vm1343_vm2, %v2515_v35, %v1279_v18  ;;  %v1016_v7 = vsel %vm948_vm7, %v2509_v39, %v884_v62  ;;  %vm685_vm11 = vcmp.eq.s32.totalorder %v621_v6, 0  ;;  %vm817_vm12 = vcmp.eq.s32.totalorder %v621_v6, 1  ;;  %v491_v62 = vpop.permute.xlu1 %490 }
 0x17c   : > { %v1543_v14 = vsel %vm1475_vm5, %v2525_v41, %v1411_v48  ;;  %v1148_v52 = vsel %vm1080_vm8, %v2511_v42, %v1016_v7  ;;  %vm1476_vm13 = vcmp.eq.s32.totalorder %v620_v2, 6  ;;  %v753_v46 = vsel %vm685_vm11, %v2505_v43, 0.0 }
 0x17d   : > { %v1675_v11 = vsel %vm1607_vm6, %v2527_v54, %v1543_v14  ;;  %v1280_v40 = vsel %vm1212_vm9, %v2513_v37, %v1148_v52  ;;  %vm1608_vm14 = vcmp.eq.s32.totalorder %v620_v2, 7  ;;  %v885_v63 = vsel %vm817_vm12, %v2507_v44, %v753_v46 }
 0x17e   : > { %1739 = vst [vmem:[%s2556_s30 + $0xb0] sm:$0xff] %v1675_v11  ;;  %v1412_v8 = vsel %vm1344_vm10, %v2515_v35, %v1280_v40  ;;  %vm949_vm15 = vcmp.eq.s32.totalorder %v621_v6, 2  ;;  %vm1081_vm1 = vcmp.eq.s32.totalorder %v621_v6, 3  ;;  %vm1213_vm2 = vcmp.eq.s32.totalorder %v621_v6, 4 }
 0x17f   : > { %v1544_v50 = vsel %vm1476_vm13, %v2525_v41, %v1412_v8  ;;  %v1017_v53 = vsel %vm949_vm15, %v2509_v39, %v885_v63  ;;  %vm1345_vm3 = vcmp.eq.s32.totalorder %v621_v6, 5  ;;  %v622_v57 = vsel %vm212_vm0, %v2379_v15, %v482_v51 }
 0x180   : > { %v1676_v47 = vsel %vm1608_vm14, %v2527_v54, %v1544_v50  ;;  %v1149_v4 = vsel %vm1081_vm1, %v2511_v42, %v1017_v53  ;;  %vm1477_vm4 = vcmp.eq.s32.totalorder %v621_v6, 6  ;;  %vm686_vm5 = vcmp.eq.s32.totalorder %v622_v57, 0 }
 0x181   : > { %1740 = vst [vmem:[%s2556_s30 + $0xb8] sm:$0xff] %v1676_v47  ;;  %v1281_v60 = vsel %vm1213_vm2, %v2513_v37, %v1149_v4  ;;  %vm818_vm6 = vcmp.eq.s32.totalorder %v622_v57, 1  ;;  %vm1609_vm7 = vcmp.eq.s32.totalorder %v621_v6, 7  ;;  %v754_v5 = vsel %vm686_vm5, %v2505_v43, 0.0 }
 0x182   : > { %v1413_v61 = vsel %vm1345_vm3, %v2515_v35, %v1281_v60  ;;  %vm950_vm8 = vcmp.eq.s32.totalorder %v622_v57, 2  ;;  %v886_v12 = vsel %vm818_vm6, %v2507_v44, %v754_v5  ;;  %vm1082_vm9 = vcmp.eq.s32.totalorder %v622_v57, 3  ;;  %v497_v60 = vpop.permute.xlu1 %496 }
 0x183   : > { %v1545_v59 = vsel %vm1477_vm4, %v2525_v41, %v1413_v61  ;;  %vm1214_vm10 = vcmp.eq.s32.totalorder %v622_v57, 4  ;;  %v1018_v58 = vsel %vm950_vm8, %v2509_v39, %v886_v12  ;;  %vm1346_vm11 = vcmp.eq.s32.totalorder %v622_v57, 5 }
 0x184   : > { %v1677_v15 = vsel %vm1609_vm7, %v2527_v54, %v1545_v59  ;;  %v623_v38 = vsel %vm212_vm0, %v2387_v20, %v485_v55  ;;  %v1150_v1 = vsel %vm1082_vm9, %v2511_v42, %v1018_v58  ;;  %vm1478_vm12 = vcmp.eq.s32.totalorder %v622_v57, 6 }
 0x185   : > { %1741 = vst [vmem:[%s2556_s30 + $0xc0] sm:$0xff] %v1677_v15  ;;  %vm687_vm13 = vcmp.eq.s32.totalorder %v623_v38, 0  ;;  %vm819_vm14 = vcmp.eq.s32.totalorder %v623_v38, 1  ;;  %v1282_v2 = vsel %vm1214_vm10, %v2513_v37, %v1150_v1  ;;  %vm1610_vm15 = vcmp.eq.s32.totalorder %v622_v57, 7 }
 0x186   : > { %v755_v49 = vsel %vm687_vm13, %v2505_v43, 0.0  ;;  %vm951_vm1 = vcmp.eq.s32.totalorder %v623_v38, 2  ;;  %v1414_v3 = vsel %vm1346_vm11, %v2515_v35, %v1282_v2  ;;  %vm1083_vm2 = vcmp.eq.s32.totalorder %v623_v38, 3 }
 0x187   : > { %v887_v6 = vsel %vm819_vm14, %v2507_v44, %v755_v49  ;;  %vm1215_vm3 = vcmp.eq.s32.totalorder %v623_v38, 4  ;;  %v1546_v20 = vsel %vm1478_vm12, %v2525_v41, %v1414_v3  ;;  %vm1347_vm4 = vcmp.eq.s32.totalorder %v623_v38, 5 }
 0x188   : > { %v1019_v45 = vsel %vm951_vm1, %v2509_v39, %v887_v6  ;;  %v624_v16 = vsel %vm212_vm0, %v2385_v17, %v488_v0  ;;  %v1678_v10 = vsel %vm1610_vm15, %v2527_v54, %v1546_v20  ;;  %vm1479_vm7 = vcmp.eq.s32.totalorder %v623_v38, 6  ;;  %v494_v17 = vpop.permute.xlu0 %493 }
 0x189   : > { %v1151_v13 = vsel %vm1083_vm2, %v2511_v42, %v1019_v45  ;;  %vm688_vm5 = vcmp.eq.s32.totalorder %v624_v16, 0  ;;  %vm820_vm6 = vcmp.eq.s32.totalorder %v624_v16, 1  ;;  %1742 = vst [vmem:[%s2556_s30 + $0xc8] sm:$0xff] %v1678_v10  ;;  %vm1611_vm8 = vcmp.eq.s32.totalorder %v623_v38, 7 }
 0x18a   : > { %v1283_v9 = vsel %vm1215_vm3, %v2513_v37, %v1151_v13  ;;  %v756_v18 = vsel %vm688_vm5, %v2505_v43, 0.0  ;;  %vm952_vm9 = vcmp.eq.s32.totalorder %v624_v16, 2  ;;  %vm1084_vm10 = vcmp.eq.s32.totalorder %v624_v16, 3 }
 0x18b   : > { %v1415_v48 = vsel %vm1347_vm4, %v2515_v35, %v1283_v9  ;;  %v888_v7 = vsel %vm820_vm6, %v2507_v44, %v756_v18  ;;  %vm1216_vm11 = vcmp.eq.s32.totalorder %v624_v16, 4  ;;  %vm1348_vm12 = vcmp.eq.s32.totalorder %v624_v16, 5 }
 0x18c   : > { %v1547_v14 = vsel %vm1479_vm7, %v2525_v41, %v1415_v48  ;;  %v1020_v52 = vsel %vm952_vm9, %v2509_v39, %v888_v7  ;;  %vm1480_vm13 = vcmp.eq.s32.totalorder %v624_v16, 6  ;;  %v625_v46 = vsel %vm212_vm0, %v2393_v22, %v491_v62  ;;  %v500_v5 = vpop.permute.xlu0 %499 }
 0x18d   : > { %v1679_v11 = vsel %vm1611_vm8, %v2527_v54, %v1547_v14  ;;  %v1152_v40 = vsel %vm1084_vm10, %v2511_v42, %v1020_v52  ;;  %vm689_vm14 = vcmp.eq.s32.totalorder %v625_v46, 0  ;;  %vm821_vm15 = vcmp.eq.s32.totalorder %v625_v46, 1 }
 0x18e   : > { %1743 = vst [vmem:[%s2556_s30 + $0xd0] sm:$0xff] %v1679_v11  ;;  %v1284_v51 = vsel %vm1216_vm11, %v2513_v37, %v1152_v40  ;;  %v626_v8 = vsel %vm212_vm0, %v2391_v19, %v494_v17  ;;  %vm1612_vm1 = vcmp.eq.s32.totalorder %v624_v16, 7  ;;  %v757_v50 = vsel %vm689_vm14, %v2505_v43, 0.0 }
 0x18f   : > { %v1416_v63 = vsel %vm1348_vm12, %v2515_v35, %v1284_v51  ;;  %vm953_vm2 = vcmp.eq.s32.totalorder %v625_v46, 2  ;;  %v889_v22 = vsel %vm821_vm15, %v2507_v44, %v757_v50  ;;  %vm1085_vm3 = vcmp.eq.s32.totalorder %v625_v46, 3 }
 0x190   : > { %v1548_v53 = vsel %vm1480_vm13, %v2525_v41, %v1416_v63  ;;  %vm1217_vm4 = vcmp.eq.s32.totalorder %v625_v46, 4  ;;  %v1021_v4 = vsel %vm953_vm2, %v2509_v39, %v889_v22  ;;  %vm1349_vm5 = vcmp.eq.s32.totalorder %v625_v46, 5  ;;  %v506_v16 = vpop.permute.xlu0 %505 }
 0x191   : > { %v1680_v47 = vsel %vm1612_vm1, %v2527_v54, %v1548_v53  ;;  %vm690_vm6 = vcmp.eq.s32.totalorder %v626_v8, 0  ;;  %v1153_v19 = vsel %vm1085_vm3, %v2511_v42, %v1021_v4  ;;  %vm1481_vm7 = vcmp.eq.s32.totalorder %v625_v46, 6 }
 0x192   : > { %1744 = vst [vmem:[%s2556_s30 + $0xd8] sm:$0xff] %v1680_v47  ;;  %v758_v57 = vsel %vm690_vm6, %v2505_v43, 0.0  ;;  %vm822_vm8 = vcmp.eq.s32.totalorder %v626_v8, 1  ;;  %v1285_v55 = vsel %vm1217_vm4, %v2513_v37, %v1153_v19  ;;  %vm1613_vm9 = vcmp.eq.s32.totalorder %v625_v46, 7 }
 0x193   : > { %v890_v61 = vsel %vm822_vm8, %v2507_v44, %v758_v57  ;;  %vm954_vm10 = vcmp.eq.s32.totalorder %v626_v8, 2  ;;  %v1417_v59 = vsel %vm1349_vm5, %v2515_v35, %v1285_v55  ;;  %vm1086_vm11 = vcmp.eq.s32.totalorder %v626_v8, 3 }
 0x194   : > { %v1022_v12 = vsel %vm954_vm10, %v2509_v39, %v890_v61  ;;  %vm1218_vm12 = vcmp.eq.s32.totalorder %v626_v8, 4  ;;  %v1549_v15 = vsel %vm1481_vm7, %v2525_v41, %v1417_v59  ;;  %vm1350_vm13 = vcmp.eq.s32.totalorder %v626_v8, 5  ;;  %v512_v55 = vpop.permute.xlu0 %511 }
 0x195   : > { %v1154_v58 = vsel %vm1086_vm11, %v2511_v42, %v1022_v12  ;;  %v627_v38 = vsel %vm212_vm0, %v2399_v24, %v497_v60  ;;  %v1681_v1 = vsel %vm1613_vm9, %v2527_v54, %v1549_v15  ;;  %vm1482_vm1 = vcmp.eq.s32.totalorder %v626_v8, 6  ;;  %v503_v24 = vpop.permute.xlu1 %502 }
 0x196   : > { %v1286_v0 = vsel %vm1218_vm12, %v2513_v37, %v1154_v58  ;;  %vm691_vm14 = vcmp.eq.s32.totalorder %v627_v38, 0  ;;  %vm823_vm15 = vcmp.eq.s32.totalorder %v627_v38, 1  ;;  %1745 = vst [vmem:[%s2556_s30 + $0xe0] sm:$0xff] %v1681_v1  ;;  %vm1614_vm2 = vcmp.eq.s32.totalorder %v626_v8, 7 }
 0x197   : > { %v1418_v2 = vsel %vm1350_vm13, %v2515_v35, %v1286_v0  ;;  %v759_v49 = vsel %vm691_vm14, %v2505_v43, 0.0  ;;  %vm955_vm3 = vcmp.eq.s32.totalorder %v627_v38, 2  ;;  %vm1087_vm4 = vcmp.eq.s32.totalorder %v627_v38, 3 }
 0x198   : > { %v1550_v3 = vsel %vm1482_vm1, %v2525_v41, %v1418_v2  ;;  %v891_v6 = vsel %vm823_vm15, %v2507_v44, %v759_v49  ;;  %vm1219_vm5 = vcmp.eq.s32.totalorder %v627_v38, 4  ;;  %vm1351_vm6 = vcmp.eq.s32.totalorder %v627_v38, 5 }
 0x199   : > { %v1682_v20 = vsel %vm1614_vm2, %v2527_v54, %v1550_v3  ;;  %v1023_v45 = vsel %vm955_vm3, %v2509_v39, %v891_v6  ;;  %vm1483_vm7 = vcmp.eq.s32.totalorder %v627_v38, 6  ;;  %vm1615_vm8 = vcmp.eq.s32.totalorder %v627_v38, 7  ;;  %v509_v46 = vpop.permute.xlu1 %508 }
 0x19a   : > { %1746 = vst [vmem:[%s2556_s30 + $0xe8] sm:$0xff] %v1682_v20  ;;  %v1155_v10 = vsel %vm1087_vm4, %v2511_v42, %v1023_v45  ;;  %v628_v13 = vsel %vm212_vm0, %v2397_v21, %v500_v5  ;;  %v629_v18 = vsel %vm212_vm0, %v2405_v26, %v503_v24  ;;  %v630_v7 = vsel %vm212_vm0, %v2403_v23, %v506_v16 }
 0x19b   : > { %v1287_v9 = vsel %vm1219_vm5, %v2513_v37, %v1155_v10  ;;  %vm692_vm9 = vcmp.eq.s32.totalorder %v628_v13, 0  ;;  %vm824_vm10 = vcmp.eq.s32.totalorder %v628_v13, 1  ;;  %vm956_vm11 = vcmp.eq.s32.totalorder %v628_v13, 2 }
 0x19c   : > { %v1419_v62 = vsel %vm1351_vm6, %v2515_v35, %v1287_v9  ;;  %v760_v48 = vsel %vm692_vm9, %v2505_v43, 0.0  ;;  %vm1088_vm12 = vcmp.eq.s32.totalorder %v628_v13, 3  ;;  %vm1220_vm13 = vcmp.eq.s32.totalorder %v628_v13, 4 }
 0x19d   : > { %v1551_v21 = vsel %vm1483_vm7, %v2525_v41, %v1419_v62  ;;  %v892_v17 = vsel %vm824_vm10, %v2507_v44, %v760_v48  ;;  %vm1352_vm14 = vcmp.eq.s32.totalorder %v628_v13, 5  ;;  %vm693_vm15 = vcmp.eq.s32.totalorder %v629_v18, 0  ;;  %v515_v59 = vpop.permute.xlu1 %514  ;;  %v518_v62 = vpop.permute.xlu0 %517 }
 0x19e   : > { %v1683_v14 = vsel %vm1615_vm8, %v2527_v54, %v1551_v21  ;;  %v1024_v52 = vsel %vm956_vm11, %v2509_v39, %v892_v17  ;;  %vm1484_vm1 = vcmp.eq.s32.totalorder %v628_v13, 6  ;;  %v761_v11 = vsel %vm693_vm15, %v2505_v43, 0.0 }
 0x19f   : > { %1747 = vst [vmem:[%s2556_s30 + $0xf0] sm:$0xff] %v1683_v14  ;;  %v1156_v26 = vsel %vm1088_vm12, %v2511_v42, %v1024_v52  ;;  %vm825_vm2 = vcmp.eq.s32.totalorder %v629_v18, 1  ;;  %vm1616_vm3 = vcmp.eq.s32.totalorder %v628_v13, 7  ;;  %vm957_vm4 = vcmp.eq.s32.totalorder %v629_v18, 2 }
 0x1a0   : > { %v1288_v23 = vsel %vm1220_vm13, %v2513_v37, %v1156_v26  ;;  %v893_v40 = vsel %vm825_vm2, %v2507_v44, %v761_v11  ;;  %vm1089_vm5 = vcmp.eq.s32.totalorder %v629_v18, 3  ;;  %vm1221_vm6 = vcmp.eq.s32.totalorder %v629_v18, 4 }
 0x1a1   : > { %v1420_v51 = vsel %vm1352_vm14, %v2515_v35, %v1288_v23  ;;  %v1025_v8 = vsel %vm957_vm4, %v2509_v39, %v893_v40  ;;  %vm1353_vm7 = vcmp.eq.s32.totalorder %v629_v18, 5  ;;  %vm694_vm8 = vcmp.eq.s32.totalorder %v630_v7, 0  ;;  %v521_v23 = vpop.permute.xlu1 %520 }
 0x1a2   : > { %v1552_v63 = vsel %vm1484_vm1, %v2525_v41, %v1420_v51  ;;  %v1157_v50 = vsel %vm1089_vm5, %v2511_v42, %v1025_v8  ;;  %v762_v47 = vsel %vm694_vm8, %v2505_v43, 0.0  ;;  %vm826_vm9 = vcmp.eq.s32.totalorder %v630_v7, 1 }
 0x1a3   : > { %v1684_v53 = vsel %vm1616_vm3, %v2527_v54, %v1552_v63  ;;  %v1289_v22 = vsel %vm1221_vm6, %v2513_v37, %v1157_v50  ;;  %vm1485_vm10 = vcmp.eq.s32.totalorder %v629_v18, 6  ;;  %v894_v19 = vsel %vm826_vm9, %v2507_v44, %v762_v47 }
 0x1a4   : > { %1748 = vst [vmem:[%s2556_s30 + $0xf8] sm:$0xff] %v1684_v53  ;;  %v1421_v4 = vsel %vm1353_vm7, %v2515_v35, %v1289_v22  ;;  %vm958_vm11 = vcmp.eq.s32.totalorder %v630_v7, 2  ;;  %vm1617_vm12 = vcmp.eq.s32.totalorder %v629_v18, 7  ;;  %vm1090_vm13 = vcmp.eq.s32.totalorder %v630_v7, 3  ;;  %v524_v22 = vpop.permute.xlu0 %523 }
 0x1a5   : > { %v1553_v57 = vsel %vm1485_vm10, %v2525_v41, %v1421_v4  ;;  %v1026_v60 = vsel %vm958_vm11, %v2509_v39, %v894_v19  ;;  %vm1222_vm14 = vcmp.eq.s32.totalorder %v630_v7, 4  ;;  %vm1354_vm15 = vcmp.eq.s32.totalorder %v630_v7, 5 }
 0x1a6   : > { %v1685_v61 = vsel %vm1617_vm12, %v2527_v54, %v1553_v57  ;;  %v1158_v5 = vsel %vm1090_vm13, %v2511_v42, %v1026_v60  ;;  %vm1486_vm1 = vcmp.eq.s32.totalorder %v630_v7, 6  ;;  %vm1618_vm2 = vcmp.eq.s32.totalorder %v630_v7, 7 }
 0x1a7   : > { %1749 = vst [vmem:[%s2556_s30 + $0x100] sm:$0xff] %v1685_v61  ;;  %v1290_v12 = vsel %vm1222_vm14, %v2513_v37, %v1158_v5  ;;  %v631_v15 = vsel %vm212_vm0, %v2411_v28, %v509_v46  ;;  %v632_v38 = vsel %vm212_vm0, %v2409_v25, %v512_v55  ;;  %v633_v2 = vsel %vm212_vm0, %v2417_v30, %v515_v59 }
 0x1a8   : > { %v1422_v58 = vsel %vm1354_vm15, %v2515_v35, %v1290_v12  ;;  %vm695_vm3 = vcmp.eq.s32.totalorder %v631_v15, 0  ;;  %vm827_vm4 = vcmp.eq.s32.totalorder %v631_v15, 1  ;;  %vm959_vm5 = vcmp.eq.s32.totalorder %v631_v15, 2 }
 0x1a9   : > { %v1554_v1 = vsel %vm1486_vm1, %v2525_v41, %v1422_v58  ;;  %v763_v0 = vsel %vm695_vm3, %v2505_v43, 0.0  ;;  %vm1091_vm6 = vcmp.eq.s32.totalorder %v631_v15, 3  ;;  %vm1223_vm7 = vcmp.eq.s32.totalorder %v631_v15, 4 }
 0x1aa   : > { %v1686_v49 = vsel %vm1618_vm2, %v2527_v54, %v1554_v1  ;;  %v895_v28 = vsel %vm827_vm4, %v2507_v44, %v763_v0  ;;  %vm1355_vm8 = vcmp.eq.s32.totalorder %v631_v15, 5  ;;  %vm696_vm9 = vcmp.eq.s32.totalorder %v632_v38, 0 }
 0x1ab   : > { %1750 = vst [vmem:[%s2556_s30 + $0x108] sm:$0xff] %v1686_v49  ;;  %v1027_v3 = vsel %vm959_vm5, %v2509_v39, %v895_v28  ;;  %vm828_vm10 = vcmp.eq.s32.totalorder %v632_v38, 1  ;;  %vm1487_vm11 = vcmp.eq.s32.totalorder %v631_v15, 6  ;;  %vm1619_vm12 = vcmp.eq.s32.totalorder %v631_v15, 7  ;;  %v527_v15 = vpop.permute.xlu1 %526 }
 0x1ac   : > { %v1159_v25 = vsel %vm1091_vm6, %v2511_v42, %v1027_v3  ;;  %v764_v6 = vsel %vm696_vm9, %v2505_v43, 0.0  ;;  %vm960_vm13 = vcmp.eq.s32.totalorder %v632_v38, 2  ;;  %vm1092_vm14 = vcmp.eq.s32.totalorder %v632_v38, 3 }
 0x1ad   : > { %v1291_v30 = vsel %vm1223_vm7, %v2513_v37, %v1159_v25  ;;  %v896_v24 = vsel %vm828_vm10, %v2507_v44, %v764_v6  ;;  %vm1224_vm15 = vcmp.eq.s32.totalorder %v632_v38, 4  ;;  %vm1356_vm1 = vcmp.eq.s32.totalorder %v632_v38, 5 }
 0x1ae   : > { %v1423_v20 = vsel %vm1355_vm8, %v2515_v35, %v1291_v30  ;;  %v1028_v45 = vsel %vm960_vm13, %v2509_v39, %v896_v24  ;;  %vm697_vm2 = vcmp.eq.s32.totalorder %v633_v2, 0  ;;  %vm829_vm3 = vcmp.eq.s32.totalorder %v633_v2, 1 }
 0x1af   : > { %v1555_v16 = vsel %vm1487_vm11, %v2525_v41, %v1423_v20  ;;  %v1160_v10 = vsel %vm1092_vm14, %v2511_v42, %v1028_v45  ;;  %vm1488_vm4 = vcmp.eq.s32.totalorder %v632_v38, 6  ;;  %v765_v18 = vsel %vm697_vm2, %v2505_v43, 0.0 }
 0x1b0   : > { %v1687_v13 = vsel %vm1619_vm12, %v2527_v54, %v1555_v16  ;;  %v1292_v9 = vsel %vm1224_vm15, %v2513_v37, %v1160_v10  ;;  %vm1620_vm5 = vcmp.eq.s32.totalorder %v632_v38, 7  ;;  %v897_v7 = vsel %vm829_vm3, %v2507_v44, %v765_v18  ;;  %v533_v10 = vpop.permute.xlu1 %532 }
 0x1b1   : > { %1751 = vst [vmem:[%s2556_s30 + $0x110] sm:$0xff] %v1687_v13  ;;  %v1424_v48 = vsel %vm1356_vm1, %v2515_v35, %v1292_v9  ;;  %vm961_vm6 = vcmp.eq.s32.totalorder %v633_v2, 2  ;;  %vm1093_vm7 = vcmp.eq.s32.totalorder %v633_v2, 3  ;;  %vm1225_vm8 = vcmp.eq.s32.totalorder %v633_v2, 4 }
 0x1b2   : > { %v1556_v21 = vsel %vm1488_vm4, %v2525_v41, %v1424_v48  ;;  %v1029_v17 = vsel %vm961_vm6, %v2509_v39, %v897_v7  ;;  %vm1357_vm9 = vcmp.eq.s32.totalorder %v633_v2, 5  ;;  %v634_v26 = vsel %vm212_vm0, %v2415_v27, %v518_v62 }
 0x1b3   : > { %v1688_v14 = vsel %vm1620_vm5, %v2527_v54, %v1556_v21  ;;  %v1161_v52 = vsel %vm1093_vm7, %v2511_v42, %v1029_v17  ;;  %vm1489_vm10 = vcmp.eq.s32.totalorder %v633_v2, 6  ;;  %vm698_vm11 = vcmp.eq.s32.totalorder %v634_v26, 0 }
 0x1b4   : > { %1752 = vst [vmem:[%s2556_s30 + $0x118] sm:$0xff] %v1688_v14  ;;  %v1293_v11 = vsel %vm1225_vm8, %v2513_v37, %v1161_v52  ;;  %vm830_vm12 = vcmp.eq.s32.totalorder %v634_v26, 1  ;;  %vm1621_vm13 = vcmp.eq.s32.totalorder %v633_v2, 7  ;;  %v766_v46 = vsel %vm698_vm11, %v2505_v43, 0.0 }
 0x1b5   : > { %v1425_v40 = vsel %vm1357_vm9, %v2515_v35, %v1293_v11  ;;  %vm962_vm14 = vcmp.eq.s32.totalorder %v634_v26, 2  ;;  %v898_v8 = vsel %vm830_vm12, %v2507_v44, %v766_v46  ;;  %vm1094_vm15 = vcmp.eq.s32.totalorder %v634_v26, 3 }
 0x1b6   : > { %v1557_v51 = vsel %vm1489_vm10, %v2525_v41, %v1425_v40  ;;  %vm1226_vm1 = vcmp.eq.s32.totalorder %v634_v26, 4  ;;  %v1030_v63 = vsel %vm962_vm14, %v2509_v39, %v898_v8  ;;  %vm1358_vm2 = vcmp.eq.s32.totalorder %v634_v26, 5 }
 0x1b7   : > { %v1689_v27 = vsel %vm1621_vm13, %v2527_v54, %v1557_v51  ;;  %v635_v50 = vsel %vm212_vm0, %v2423_v32, %v521_v23  ;;  %v1162_v53 = vsel %vm1094_vm15, %v2511_v42, %v1030_v63  ;;  %vm1490_vm3 = vcmp.eq.s32.totalorder %v634_v26, 6 }
 0x1b8   : > { %1753 = vst [vmem:[%s2556_s30 + $0x120] sm:$0xff] %v1689_v27  ;;  %vm699_vm4 = vcmp.eq.s32.totalorder %v635_v50, 0  ;;  %vm831_vm5 = vcmp.eq.s32.totalorder %v635_v50, 1  ;;  %v1294_v47 = vsel %vm1226_vm1, %v2513_v37, %v1162_v53  ;;  %vm1622_vm6 = vcmp.eq.s32.totalorder %v634_v26, 7  ;;  %v3400_v53 = vld [vmem:[#allocation15_spill] sm:$0xff] }
 0x1b9   : > { %v767_v4 = vsel %vm699_vm4, %v2505_v43, 0.0  ;;  %vm963_vm7 = vcmp.eq.s32.totalorder %v635_v50, 2  ;;  %v1426_v19 = vsel %vm1358_vm2, %v2515_v35, %v1294_v47  ;;  %vm1095_vm8 = vcmp.eq.s32.totalorder %v635_v50, 3 }
 0x1ba   : > { %v899_v57 = vsel %vm831_vm5, %v2507_v44, %v767_v4  ;;  %vm1227_vm9 = vcmp.eq.s32.totalorder %v635_v50, 4  ;;  %v1558_v32 = vsel %vm1490_vm3, %v2525_v41, %v1426_v19  ;;  %vm1359_vm10 = vcmp.eq.s32.totalorder %v635_v50, 5  ;;  %v3401_v19 = vld [vmem:[#allocation14_spill] sm:$0xff] }
 0x1bb   : > { %v1031_v60 = vsel %vm963_vm7, %v2509_v39, %v899_v57  ;;  %v636_v55 = vsel %vm212_vm0, %v2421_v29, %v524_v22  ;;  %v1690_v61 = vsel %vm1622_vm6, %v2527_v54, %v1558_v32  ;;  %vm1491_vm13 = vcmp.eq.s32.totalorder %v635_v50, 6  ;;  %v530_v29 = vpop.permute.xlu0 %529 }
 0x1bc   : > { %v1163_v5 = vsel %vm1095_vm8, %v2511_v42, %v1031_v60  ;;  %vm700_vm11 = vcmp.eq.s32.totalorder %v636_v55, 0  ;;  %vm832_vm12 = vcmp.eq.s32.totalorder %v636_v55, 1  ;;  %1754 = vst [vmem:[%s2556_s30 + $0x128] sm:$0xff] %v1690_v61  ;;  %vm1623_vm14 = vcmp.eq.s32.totalorder %v635_v50, 7 }
 0x1bd   : > { %v1295_v59 = vsel %vm1227_vm9, %v2513_v37, %v1163_v5  ;;  %v768_v12 = vsel %vm700_vm11, %v2505_v43, 0.0  ;;  %vm964_vm15 = vcmp.eq.s32.totalorder %v636_v55, 2  ;;  %vm1096_vm1 = vcmp.eq.s32.totalorder %v636_v55, 3 }
 0x1be   : > { %v1427_v58 = vsel %vm1359_vm10, %v2515_v35, %v1295_v59  ;;  %v900_v38 = vsel %vm832_vm12, %v2507_v44, %v768_v12  ;;  %vm1228_vm2 = vcmp.eq.s32.totalorder %v636_v55, 4  ;;  %vm1360_vm3 = vcmp.eq.s32.totalorder %v636_v55, 5 }
 0x1bf   : > { %v1559_v1 = vsel %vm1491_vm13, %v2525_v41, %v1427_v58  ;;  %v1032_v0 = vsel %vm964_vm15, %v2509_v39, %v900_v38  ;;  %vm1492_vm4 = vcmp.eq.s32.totalorder %v636_v55, 6  ;;  %v637_v28 = vsel %vm212_vm0, %v2429_v34, %v527_v15  ;;  %v536_v18 = vpop.permute.xlu0 %535 }
 0x1c0   : > { %v1691_v2 = vsel %vm1623_vm14, %v2527_v54, %v1559_v1  ;;  %v1164_v49 = vsel %vm1096_vm1, %v2511_v42, %v1032_v0  ;;  %vm701_vm5 = vcmp.eq.s32.totalorder %v637_v28, 0  ;;  %vm833_vm6 = vcmp.eq.s32.totalorder %v637_v28, 1 }
 0x1c1   : > { %1755 = vst [vmem:[%s2556_s30 + $0x130] sm:$0xff] %v1691_v2  ;;  %v1296_v3 = vsel %vm1228_vm2, %v2513_v37, %v1164_v49  ;;  %v638_v25 = vsel %vm212_vm0, %v2427_v31, %v530_v29  ;;  %vm1624_vm7 = vcmp.eq.s32.totalorder %v636_v55, 7  ;;  %v769_v30 = vsel %vm701_vm5, %v2505_v43, 0.0 }
 0x1c2   : > { %v1428_v6 = vsel %vm1360_vm3, %v2515_v35, %v1296_v3  ;;  %vm965_vm8 = vcmp.eq.s32.totalorder %v637_v28, 2  ;;  %v901_v34 = vsel %vm833_vm6, %v2507_v44, %v769_v30  ;;  %vm1097_vm9 = vcmp.eq.s32.totalorder %v637_v28, 3 }
 0x1c3   : > { %v1560_v24 = vsel %vm1492_vm4, %v2525_v41, %v1428_v6  ;;  %vm1229_vm10 = vcmp.eq.s32.totalorder %v637_v28, 4  ;;  %v1033_v45 = vsel %vm965_vm8, %v2509_v39, %v901_v34  ;;  %vm1361_vm11 = vcmp.eq.s32.totalorder %v637_v28, 5  ;;  %v542_v8 = vpop.permute.xlu0 %541 }
 0x1c4   : > { %v1692_v20 = vsel %vm1624_vm7, %v2527_v54, %v1560_v24  ;;  %vm702_vm12 = vcmp.eq.s32.totalorder %v638_v25, 0  ;;  %v1165_v31 = vsel %vm1097_vm9, %v2511_v42, %v1033_v45  ;;  %vm1493_vm13 = vcmp.eq.s32.totalorder %v637_v28, 6 }
 0x1c5   : > { %1756 = vst [vmem:[%s2556_s30 + $0x138] sm:$0xff] %v1692_v20  ;;  %v770_v16 = vsel %vm702_vm12, %v2505_v43, 0.0  ;;  %vm834_vm14 = vcmp.eq.s32.totalorder %v638_v25, 1  ;;  %v1297_v13 = vsel %vm1229_vm10, %v2513_v37, %v1165_v31  ;;  %vm1625_vm15 = vcmp.eq.s32.totalorder %v637_v28, 7  ;;  %v3402_v31 = vld [vmem:[#allocation17_spill] sm:$0xff] }
 0x1c6   : > { %v902_v9 = vsel %vm834_vm14, %v2507_v44, %v770_v16  ;;  %vm966_vm1 = vcmp.eq.s32.totalorder %v638_v25, 2  ;;  %v1429_v62 = vsel %vm1361_vm11, %v2515_v35, %v1297_v13  ;;  %vm1098_vm2 = vcmp.eq.s32.totalorder %v638_v25, 3  ;;  %v3403_v13 = vld [vmem:[#allocation16_spill] sm:$0xff] }
 0x1c7   : > { %v1034_v48 = vsel %vm966_vm1, %v2509_v39, %v902_v9  ;;  %vm1230_vm3 = vcmp.eq.s32.totalorder %v638_v25, 4  ;;  %v1561_v7 = vsel %vm1493_vm13, %v2525_v41, %v1429_v62  ;;  %vm1362_vm4 = vcmp.eq.s32.totalorder %v638_v25, 5  ;;  %v548_v30 = vpop.permute.xlu0 %547 }
 0x1c8   : > { %v1166_v21 = vsel %vm1098_vm2, %v2511_v42, %v1034_v48  ;;  %v639_v17 = vsel %vm212_vm0, %v2435_v36, %v533_v10  ;;  %v1693_v14 = vsel %vm1625_vm15, %v2527_v54, %v1561_v7  ;;  %vm1494_vm7 = vcmp.eq.s32.totalorder %v638_v25, 6  ;;  %v539_v36 = vpop.permute.xlu1 %538  ;;  %v3404_v48 = vld [vmem:[#allocation19_spill] sm:$0xff] }
 0x1c9   : > { %v1298_v52 = vsel %vm1230_vm3, %v2513_v37, %v1166_v21  ;;  %vm703_vm5 = vcmp.eq.s32.totalorder %v639_v17, 0  ;;  %vm835_vm6 = vcmp.eq.s32.totalorder %v639_v17, 1  ;;  %1757 = vst [vmem:[%s2556_s30 + $0x140] sm:$0xff] %v1693_v14  ;;  %vm1626_vm8 = vcmp.eq.s32.totalorder %v638_v25, 7 }
 0x1ca   : > { %v1430_v26 = vsel %vm1362_vm4, %v2515_v35, %v1298_v52  ;;  %v771_v11 = vsel %vm703_vm5, %v2505_v43, 0.0  ;;  %vm967_vm9 = vcmp.eq.s32.totalorder %v639_v17, 2  ;;  %vm1099_vm10 = vcmp.eq.s32.totalorder %v639_v17, 3 }
 0x1cb   : > { %v1562_v23 = vsel %vm1494_vm7, %v2525_v41, %v1430_v26  ;;  %v903_v40 = vsel %vm835_vm6, %v2507_v44, %v771_v11  ;;  %vm1231_vm11 = vcmp.eq.s32.totalorder %v639_v17, 4  ;;  %vm1363_vm12 = vcmp.eq.s32.totalorder %v639_v17, 5 }
 0x1cc   : > { %v1694_v46 = vsel %vm1626_vm8, %v2527_v54, %v1562_v23  ;;  %v1035_v51 = vsel %vm967_vm9, %v2509_v39, %v903_v40  ;;  %vm1495_vm13 = vcmp.eq.s32.totalorder %v639_v17, 6  ;;  %vm1627_vm14 = vcmp.eq.s32.totalorder %v639_v17, 7  ;;  %v545_v15 = vpop.permute.xlu1 %544 }
 0x1cd   : > { %1758 = vst [vmem:[%s2556_s30 + $0x148] sm:$0xff] %v1694_v46  ;;  %v1167_v27 = vsel %vm1099_vm10, %v2511_v42, %v1035_v51  ;;  %v640_v63 = vsel %vm212_vm0, %v2433_v33, %v536_v18  ;;  %v641_v22 = vsel %vm212_vm0, %v3400_v53, %v539_v36  ;;  %v642_v57 = vsel %vm212_vm0, %v3401_v19, %v542_v8 }
 0x1ce   : > { %v1299_v50 = vsel %vm1231_vm11, %v2513_v37, %v1167_v27  ;;  %vm704_vm15 = vcmp.eq.s32.totalorder %v640_v63, 0  ;;  %vm836_vm1 = vcmp.eq.s32.totalorder %v640_v63, 1  ;;  %vm968_vm2 = vcmp.eq.s32.totalorder %v640_v63, 2 }
 0x1cf   : > { %v1431_v47 = vsel %vm1363_vm12, %v2515_v35, %v1299_v50  ;;  %v772_v4 = vsel %vm704_vm15, %v2505_v43, 0.0  ;;  %vm1100_vm3 = vcmp.eq.s32.totalorder %v640_v63, 3  ;;  %vm1232_vm4 = vcmp.eq.s32.totalorder %v640_v63, 4  ;;  %v554_v50 = vpop.permute.xlu0 %553 }
 0x1d0   : > { %v1563_v33 = vsel %vm1495_vm13, %v2525_v41, %v1431_v47  ;;  %v904_v32 = vsel %vm836_vm1, %v2507_v44, %v772_v4  ;;  %vm1364_vm5 = vcmp.eq.s32.totalorder %v640_v63, 5  ;;  %vm705_vm6 = vcmp.eq.s32.totalorder %v641_v22, 0  ;;  %v551_v20 = vpop.permute.xlu1 %550 }
 0x1d1   : > { %v1695_v60 = vsel %vm1627_vm14, %v2527_v54, %v1563_v33  ;;  %v1036_v55 = vsel %vm968_vm2, %v2509_v39, %v904_v32  ;;  %vm1496_vm7 = vcmp.eq.s32.totalorder %v640_v63, 6  ;;  %v773_v5 = vsel %vm705_vm6, %v2505_v43, 0.0  ;;  %v3405_v33 = vld [vmem:[#allocation18_spill] sm:$0xff] }
 0x1d2   : > { %1759 = vst [vmem:[%s2556_s30 + $0x150] sm:$0xff] %v1695_v60  ;;  %v1168_v61 = vsel %vm1100_vm3, %v2511_v42, %v1036_v55  ;;  %vm837_vm8 = vcmp.eq.s32.totalorder %v641_v22, 1  ;;  %vm1628_vm9 = vcmp.eq.s32.totalorder %v640_v63, 7  ;;  %vm969_vm10 = vcmp.eq.s32.totalorder %v641_v22, 2 }
 0x1d3   : > { %v1300_v59 = vsel %vm1232_vm4, %v2513_v37, %v1168_v61  ;;  %v905_v12 = vsel %vm837_vm8, %v2507_v44, %v773_v5  ;;  %vm1101_vm11 = vcmp.eq.s32.totalorder %v641_v22, 3  ;;  %vm1233_vm12 = vcmp.eq.s32.totalorder %v641_v22, 4 }
 0x1d4   : > { %v1432_v58 = vsel %vm1364_vm5, %v2515_v35, %v1300_v59  ;;  %v1037_v38 = vsel %vm969_vm10, %v2509_v39, %v905_v12  ;;  %vm1365_vm13 = vcmp.eq.s32.totalorder %v641_v22, 5  ;;  %vm706_vm14 = vcmp.eq.s32.totalorder %v642_v57, 0  ;;  %v557_v55 = vpop.permute.xlu1 %556 }
 0x1d5   : > { %v1564_v29 = vsel %vm1496_vm7, %v2525_v41, %v1432_v58  ;;  %v1169_v1 = vsel %vm1101_vm11, %v2511_v42, %v1037_v38  ;;  %v774_v49 = vsel %vm706_vm14, %v2505_v43, 0.0  ;;  %vm838_vm15 = vcmp.eq.s32.totalorder %v642_v57, 1  ;;  %v3406_v38 = vld [vmem:[#allocation21_spill] sm:$0xff] }
 0x1d6   : > { %v1696_v0 = vsel %vm1628_vm9, %v2527_v54, %v1564_v29  ;;  %v1301_v2 = vsel %vm1233_vm12, %v2513_v37, %v1169_v1  ;;  %vm1497_vm1 = vcmp.eq.s32.totalorder %v641_v22, 6  ;;  %v906_v3 = vsel %vm838_vm15, %v2507_v44, %v774_v49 }
 0x1d7   : > { %1760 = vst [vmem:[%s2556_s30 + $0x158] sm:$0xff] %v1696_v0  ;;  %v1433_v28 = vsel %vm1365_vm13, %v2515_v35, %v1301_v2  ;;  %vm970_vm2 = vcmp.eq.s32.totalorder %v642_v57, 2  ;;  %vm1629_vm3 = vcmp.eq.s32.totalorder %v641_v22, 7  ;;  %vm1102_vm4 = vcmp.eq.s32.totalorder %v642_v57, 3  ;;  %v560_v0 = vpop.permute.xlu0 %559 }
 0x1d8   : > { %v1565_v25 = vsel %vm1497_vm1, %v2525_v41, %v1433_v28  ;;  %v1038_v6 = vsel %vm970_vm2, %v2509_v39, %v906_v3  ;;  %vm1234_vm5 = vcmp.eq.s32.totalorder %v642_v57, 4  ;;  %vm1366_vm6 = vcmp.eq.s32.totalorder %v642_v57, 5 }
 0x1d9   : > { %v1697_v24 = vsel %vm1629_vm3, %v2527_v54, %v1565_v25  ;;  %v1170_v34 = vsel %vm1102_vm4, %v2511_v42, %v1038_v6  ;;  %vm1498_vm7 = vcmp.eq.s32.totalorder %v642_v57, 6  ;;  %vm1630_vm8 = vcmp.eq.s32.totalorder %v642_v57, 7 }
 0x1da   : > { %1761 = vst [vmem:[%s2556_s30 + $0x160] sm:$0xff] %v1697_v24  ;;  %v1302_v45 = vsel %vm1234_vm5, %v2513_v37, %v1170_v34  ;;  %v643_v16 = vsel %vm212_vm0, %v3402_v31, %v545_v15  ;;  %v644_v9 = vsel %vm212_vm0, %v3403_v13, %v548_v30  ;;  %v645_v7 = vsel %vm212_vm0, %v3404_v48, %v551_v20  ;;  %v3407_v30 = vld [vmem:[#allocation20_spill] sm:$0xff] }
 0x1db   : > { %v1434_v10 = vsel %vm1366_vm6, %v2515_v35, %v1302_v45  ;;  %vm707_vm9 = vcmp.eq.s32.totalorder %v643_v16, 0  ;;  %vm839_vm10 = vcmp.eq.s32.totalorder %v643_v16, 1  ;;  %vm971_vm11 = vcmp.eq.s32.totalorder %v643_v16, 2 }
 0x1dc   : > { %v1566_v18 = vsel %vm1498_vm7, %v2525_v41, %v1434_v10  ;;  %v775_v62 = vsel %vm707_vm9, %v2505_v43, 0.0  ;;  %vm1103_vm12 = vcmp.eq.s32.totalorder %v643_v16, 3  ;;  %vm1235_vm13 = vcmp.eq.s32.totalorder %v643_v16, 4 }
 0x1dd   : > { %v1698_v21 = vsel %vm1630_vm8, %v2527_v54, %v1566_v18  ;;  %v907_v17 = vsel %vm839_vm10, %v2507_v44, %v775_v62  ;;  %vm1367_vm14 = vcmp.eq.s32.totalorder %v643_v16, 5  ;;  %vm708_vm15 = vcmp.eq.s32.totalorder %v644_v9, 0 }
 0x1de   : > { %1762 = vst [vmem:[%s2556_s30 + $0x168] sm:$0xff] %v1698_v21  ;;  %v1039_v14 = vsel %vm971_vm11, %v2509_v39, %v907_v17  ;;  %vm840_vm1 = vcmp.eq.s32.totalorder %v644_v9, 1  ;;  %vm1499_vm2 = vcmp.eq.s32.totalorder %v643_v16, 6  ;;  %vm1631_vm3 = vcmp.eq.s32.totalorder %v643_v16, 7  ;;  %v563_v16 = vpop.permute.xlu1 %562  ;;  %v3408_v21 = vld [vmem:[#allocation23_spill] sm:$0xff] }
 0x1df   : > { %v1171_v52 = vsel %vm1103_vm12, %v2511_v42, %v1039_v14  ;;  %v776_v26 = vsel %vm708_vm15, %v2505_v43, 0.0  ;;  %vm972_vm4 = vcmp.eq.s32.totalorder %v644_v9, 2  ;;  %vm1104_vm5 = vcmp.eq.s32.totalorder %v644_v9, 3 }
 0x1e0   : > { %v1303_v11 = vsel %vm1235_vm13, %v2513_v37, %v1171_v52  ;;  %v908_v23 = vsel %vm840_vm1, %v2507_v44, %v776_v26  ;;  %vm1236_vm6 = vcmp.eq.s32.totalorder %v644_v9, 4  ;;  %vm1368_vm7 = vcmp.eq.s32.totalorder %v644_v9, 5  ;;  %v3409_v52 = vld [vmem:[#allocation22_spill] sm:$0xff] }
 0x1e1   : > { %v1435_v40 = vsel %vm1367_vm14, %v2515_v35, %v1303_v11  ;;  %v1040_v36 = vsel %vm972_vm4, %v2509_v39, %v908_v23  ;;  %vm709_vm8 = vcmp.eq.s32.totalorder %v645_v7, 0  ;;  %vm841_vm9 = vcmp.eq.s32.totalorder %v645_v7, 1 }
 0x1e2   : > { %v1567_v46 = vsel %vm1499_vm2, %v2525_v41, %v1435_v40  ;;  %v1172_v51 = vsel %vm1104_vm5, %v2511_v42, %v1040_v36  ;;  %vm1500_vm10 = vcmp.eq.s32.totalorder %v644_v9, 6  ;;  %v777_v63 = vsel %vm709_vm8, %v2505_v43, 0.0 }
 0x1e3   : > { %v1699_v8 = vsel %vm1631_vm3, %v2527_v54, %v1567_v46  ;;  %v1304_v27 = vsel %vm1236_vm6, %v2513_v37, %v1172_v51  ;;  %vm1632_vm11 = vcmp.eq.s32.totalorder %v644_v9, 7  ;;  %v909_v22 = vsel %vm841_vm9, %v2507_v44, %v777_v63  ;;  %v566_v9 = vpop.permute.xlu0 %565  ;;  %v569_v63 = vpop.permute.xlu1 %568 }
 0x1e4   : > { %1763 = vst [vmem:[%s2556_s30 + $0x170] sm:$0xff] %v1699_v8  ;;  %v1436_v53 = vsel %vm1368_vm7, %v2515_v35, %v1304_v27  ;;  %vm973_vm12 = vcmp.eq.s32.totalorder %v645_v7, 2  ;;  %vm1105_vm13 = vcmp.eq.s32.totalorder %v645_v7, 3  ;;  %vm1237_vm14 = vcmp.eq.s32.totalorder %v645_v7, 4 }
 0x1e5   : > { %v1568_v47 = vsel %vm1500_vm10, %v2525_v41, %v1436_v53  ;;  %v1041_v4 = vsel %vm973_vm12, %v2509_v39, %v909_v22  ;;  %vm1369_vm15 = vcmp.eq.s32.totalorder %v645_v7, 5  ;;  %v646_v32 = vsel %vm212_vm0, %v3405_v33, %v554_v50  ;;  %v3410_v33 = vld [vmem:[#allocation25_spill] sm:$0xff] }
 0x1e6   : > { %v1700_v19 = vsel %vm1632_vm11, %v2527_v54, %v1568_v47  ;;  %v1173_v57 = vsel %vm1105_vm13, %v2511_v42, %v1041_v4  ;;  %vm1501_vm1 = vcmp.eq.s32.totalorder %v645_v7, 6  ;;  %vm710_vm2 = vcmp.eq.s32.totalorder %v646_v32, 0 }
 0x1e7   : > { %1764 = vst [vmem:[%s2556_s30 + $0x178] sm:$0xff] %v1700_v19  ;;  %v1305_v60 = vsel %vm1237_vm14, %v2513_v37, %v1173_v57  ;;  %vm842_vm3 = vcmp.eq.s32.totalorder %v646_v32, 1  ;;  %vm1633_vm4 = vcmp.eq.s32.totalorder %v645_v7, 7  ;;  %v778_v5 = vsel %vm710_vm2, %v2505_v43, 0.0  ;;  %v572_v22 = vpop.permute.xlu0 %571 }
 0x1e8   : > { %v1437_v61 = vsel %vm1369_vm15, %v2515_v35, %v1305_v60  ;;  %vm974_vm5 = vcmp.eq.s32.totalorder %v646_v32, 2  ;;  %v910_v12 = vsel %vm842_vm3, %v2507_v44, %v778_v5  ;;  %vm1106_vm6 = vcmp.eq.s32.totalorder %v646_v32, 3 }
 0x1e9   : > { %v1569_v59 = vsel %vm1501_vm1, %v2525_v41, %v1437_v61  ;;  %vm1238_vm7 = vcmp.eq.s32.totalorder %v646_v32, 4  ;;  %v1042_v58 = vsel %vm974_vm5, %v2509_v39, %v910_v12  ;;  %vm1370_vm8 = vcmp.eq.s32.totalorder %v646_v32, 5 }
 0x1ea   : > { %v1701_v15 = vsel %vm1633_vm4, %v2527_v54, %v1569_v59  ;;  %v647_v29 = vsel %vm212_vm0, %v3406_v38, %v557_v55  ;;  %v1174_v1 = vsel %vm1106_vm6, %v2511_v42, %v1042_v58  ;;  %vm1502_vm9 = vcmp.eq.s32.totalorder %v646_v32, 6 }
 0x1eb   : > { %1765 = vst [vmem:[%s2556_s30 + $0x180] sm:$0xff] %v1701_v15  ;;  %vm711_vm10 = vcmp.eq.s32.totalorder %v647_v29, 0  ;;  %vm843_vm11 = vcmp.eq.s32.totalorder %v647_v29, 1  ;;  %v1306_v2 = vsel %vm1238_vm7, %v2513_v37, %v1174_v1  ;;  %vm1634_vm12 = vcmp.eq.s32.totalorder %v646_v32, 7  ;;  %v575_v15 = vpop.permute.xlu1 %574 }
 0x1ec   : > { %v779_v49 = vsel %vm711_vm10, %v2505_v43, 0.0  ;;  %vm975_vm13 = vcmp.eq.s32.totalorder %v647_v29, 2  ;;  %v1438_v28 = vsel %vm1370_vm8, %v2515_v35, %v1306_v2  ;;  %vm1107_vm14 = vcmp.eq.s32.totalorder %v647_v29, 3 }
 0x1ed   : > { %v911_v3 = vsel %vm843_vm11, %v2507_v44, %v779_v49  ;;  %vm1239_vm15 = vcmp.eq.s32.totalorder %v647_v29, 4  ;;  %v1570_v25 = vsel %vm1502_vm9, %v2525_v41, %v1438_v28  ;;  %vm1371_vm1 = vcmp.eq.s32.totalorder %v647_v29, 5  ;;  %v3412_v28 = vld [vmem:[#allocation27_spill] sm:$0xff] }
 0x1ee   : > { %v1043_v6 = vsel %vm975_vm13, %v2509_v39, %v911_v3  ;;  %v648_v24 = vsel %vm212_vm0, %v3407_v30, %v560_v0  ;;  %v1702_v34 = vsel %vm1634_vm12, %v2527_v54, %v1570_v25  ;;  %vm1503_vm4 = vcmp.eq.s32.totalorder %v647_v29, 6  ;;  %v3411_v0 = vld [vmem:[#allocation24_spill] sm:$0xff]  ;;  %v3413_v30 = vld [vmem:[#allocation26_spill] sm:$0xff] }
 0x1ef   : > { %v1175_v20 = vsel %vm1107_vm14, %v2511_v42, %v1043_v6  ;;  %vm712_vm2 = vcmp.eq.s32.totalorder %v648_v24, 0  ;;  %vm844_vm3 = vcmp.eq.s32.totalorder %v648_v24, 1  ;;  %1766 = vst [vmem:[%s2556_s30 + $0x188] sm:$0xff] %v1702_v34  ;;  %vm1635_vm5 = vcmp.eq.s32.totalorder %v647_v29, 7  ;;  %v578_v29 = vpop.permute.xlu0 %577 }
 0x1f0   : > { %v1307_v45 = vsel %vm1239_vm15, %v2513_v37, %v1175_v20  ;;  %v780_v31 = vsel %vm712_vm2, %v2505_v43, 0.0  ;;  %vm976_vm6 = vcmp.eq.s32.totalorder %v648_v24, 2  ;;  %vm1108_vm7 = vcmp.eq.s32.totalorder %v648_v24, 3 }
 0x1f1   : > { %v1439_v10 = vsel %vm1371_vm1, %v2515_v35, %v1307_v45  ;;  %v912_v13 = vsel %vm844_vm3, %v2507_v44, %v780_v31  ;;  %vm1240_vm8 = vcmp.eq.s32.totalorder %v648_v24, 4  ;;  %vm1372_vm9 = vcmp.eq.s32.totalorder %v648_v24, 5 }
 0x1f2   : > { %v1571_v18 = vsel %vm1503_vm4, %v2525_v41, %v1439_v10  ;;  %v1044_v62 = vsel %vm976_vm6, %v2509_v39, %v912_v13  ;;  %vm1504_vm10 = vcmp.eq.s32.totalorder %v648_v24, 6  ;;  %v649_v17 = vsel %vm212_vm0, %v3408_v21, %v563_v16 }
 0x1f3   : > { %v1703_v48 = vsel %vm1635_vm5, %v2527_v54, %v1571_v18  ;;  %v1176_v7 = vsel %vm1108_vm7, %v2511_v42, %v1044_v62  ;;  %vm713_vm11 = vcmp.eq.s32.totalorder %v649_v17, 0  ;;  %vm845_vm12 = vcmp.eq.s32.totalorder %v649_v17, 1  ;;  %v581_v18 = vpop.permute.xlu1 %580 }
 0x1f4   : > { %1767 = vst [vmem:[%s2556_s30 + $0x190] sm:$0xff] %v1703_v48  ;;  %v1308_v14 = vsel %vm1240_vm8, %v2513_v37, %v1176_v7  ;;  %v650_v26 = vsel %vm212_vm0, %v3409_v52, %v566_v9  ;;  %vm1636_vm13 = vcmp.eq.s32.totalorder %v648_v24, 7  ;;  %v781_v23 = vsel %vm713_vm11, %v2505_v43, 0.0 }
 0x1f5   : > { %v1440_v11 = vsel %vm1372_vm9, %v2515_v35, %v1308_v14  ;;  %vm977_vm14 = vcmp.eq.s32.totalorder %v649_v17, 2  ;;  %v913_v36 = vsel %vm845_vm12, %v2507_v44, %v781_v23  ;;  %vm1109_vm15 = vcmp.eq.s32.totalorder %v649_v17, 3 }
 0x1f6   : > { %v1572_v40 = vsel %vm1504_vm10, %v2525_v41, %v1440_v11  ;;  %vm1241_vm1 = vcmp.eq.s32.totalorder %v649_v17, 4  ;;  %v1045_v51 = vsel %vm977_vm14, %v2509_v39, %v913_v36  ;;  %vm1373_vm2 = vcmp.eq.s32.totalorder %v649_v17, 5  ;;  %v584_v36 = vpop.permute.xlu0 %583 }
 0x1f7   : > { %v1704_v46 = vsel %vm1636_vm13, %v2527_v54, %v1572_v40  ;;  %vm714_vm3 = vcmp.eq.s32.totalorder %v650_v26, 0  ;;  %v1177_v8 = vsel %vm1109_vm15, %v2511_v42, %v1045_v51  ;;  %vm1505_vm4 = vcmp.eq.s32.totalorder %v649_v17, 6 }
 0x1f8   : > { %1768 = vst [vmem:[%s2556_s30 + $0x198] sm:$0xff] %v1704_v46  ;;  %v782_v27 = vsel %vm714_vm3, %v2505_v43, 0.0  ;;  %vm846_vm5 = vcmp.eq.s32.totalorder %v650_v26, 1  ;;  %v1309_v50 = vsel %vm1241_vm1, %v2513_v37, %v1177_v8  ;;  %vm1637_vm6 = vcmp.eq.s32.totalorder %v649_v17, 7  ;;  %v587_v8 = vpop.permute.xlu1 %586 }
 0x1f9   : > { %v914_v53 = vsel %vm846_vm5, %v2507_v44, %v782_v27  ;;  %vm978_vm7 = vcmp.eq.s32.totalorder %v650_v26, 2  ;;  %v1441_v47 = vsel %vm1373_vm2, %v2515_v35, %v1309_v50  ;;  %vm1110_vm8 = vcmp.eq.s32.totalorder %v650_v26, 3 }
 0x1fa   : > { %v1046_v4 = vsel %vm978_vm7, %v2509_v39, %v914_v53  ;;  %vm1242_vm9 = vcmp.eq.s32.totalorder %v650_v26, 4  ;;  %v1573_v19 = vsel %vm1505_vm4, %v2525_v41, %v1441_v47  ;;  %vm1374_vm10 = vcmp.eq.s32.totalorder %v650_v26, 5 }
 0x1fb   : > { %v1178_v57 = vsel %vm1110_vm8, %v2511_v42, %v1046_v4  ;;  %v651_v32 = vsel %vm212_vm0, %v3410_v33, %v569_v63  ;;  %v1705_v60 = vsel %vm1637_vm6, %v2527_v54, %v1573_v19  ;;  %vm1506_vm13 = vcmp.eq.s32.totalorder %v650_v26, 6  ;;  %v3414_v63 = vld [vmem:[#allocation28_spill] sm:$0xff] }
 0x1fc   : > { %v1310_v55 = vsel %vm1242_vm9, %v2513_v37, %v1178_v57  ;;  %vm715_vm11 = vcmp.eq.s32.totalorder %v651_v32, 0  ;;  %vm847_vm12 = vcmp.eq.s32.totalorder %v651_v32, 1  ;;  %1769 = vst [vmem:[%s2556_s30 + $0x1a0] sm:$0xff] %v1705_v60  ;;  %vm1638_vm14 = vcmp.eq.s32.totalorder %v650_v26, 7  ;;  %v3416_v57 = vld [vmem:[#allocation6_spill] sm:$0xff] }
 0x1fd   : > { %v1442_v61 = vsel %vm1374_vm10, %v2515_v35, %v1310_v55  ;;  %v783_v5 = vsel %vm715_vm11, %v2505_v43, 0.0  ;;  %vm979_vm15 = vcmp.eq.s32.totalorder %v651_v32, 2  ;;  %vm1111_vm1 = vcmp.eq.s32.totalorder %v651_v32, 3 }
 0x1fe   : > { %v1574_v59 = vsel %vm1506_vm13, %v2525_v41, %v1442_v61  ;;  %v915_v12 = vsel %vm847_vm12, %v2507_v44, %v783_v5  ;;  %vm1243_vm2 = vcmp.eq.s32.totalorder %v651_v32, 4  ;;  %vm1375_vm3 = vcmp.eq.s32.totalorder %v651_v32, 5 }
 0x1ff   : > { %v1706_v58 = vsel %vm1638_vm14, %v2527_v54, %v1574_v59  ;;  %v1047_v38 = vsel %vm979_vm15, %v2509_v39, %v915_v12  ;;  %vm1507_vm4 = vcmp.eq.s32.totalorder %v651_v32, 6  ;;  %vm1639_vm5 = vcmp.eq.s32.totalorder %v651_v32, 7 }
 0x200   : > { %1770 = vst [vmem:[%s2556_s30 + $0x1a8] sm:$0xff] %v1706_v58  ;;  %v1179_v1 = vsel %vm1111_vm1, %v2511_v42, %v1047_v38  ;;  %v652_v2 = vsel %vm212_vm0, %v3411_v0, %v572_v22  ;;  %v653_v3 = vsel %vm212_vm0, %v3412_v28, %v575_v15  ;;  %v654_v24 = vsel %vm212_vm0, %v3413_v30, %v578_v29  ;;  %v3415_v22 = vld [vmem:[#allocation5_spill] sm:$0xff] }
 0x201   : > { %v1311_v49 = vsel %vm1243_vm2, %v2513_v37, %v1179_v1  ;;  %vm716_vm6 = vcmp.eq.s32.totalorder %v652_v2, 0  ;;  %vm848_vm7 = vcmp.eq.s32.totalorder %v652_v2, 1  ;;  %vm980_vm8 = vcmp.eq.s32.totalorder %v652_v2, 2 }
 0x202   : > { %v1443_v25 = vsel %vm1375_vm3, %v2515_v35, %v1311_v49  ;;  %v784_v6 = vsel %vm716_vm6, %v2505_v43, 0.0  ;;  %vm1112_vm9 = vcmp.eq.s32.totalorder %v652_v2, 3  ;;  %vm1244_vm10 = vcmp.eq.s32.totalorder %v652_v2, 4  ;;  %v590_v49 = vpop.permute.xlu0 %589 }
 0x203   : > { %v1575_v34 = vsel %vm1507_vm4, %v2525_v41, %v1443_v25  ;;  %v916_v20 = vsel %vm848_vm7, %v2507_v44, %v784_v6  ;;  %vm1376_vm11 = vcmp.eq.s32.totalorder %v652_v2, 5  ;;  %vm717_vm12 = vcmp.eq.s32.totalorder %v653_v3, 0 }
 0x204   : > { %v1707_v45 = vsel %vm1639_vm5, %v2527_v54, %v1575_v34  ;;  %v1048_v31 = vsel %vm980_vm8, %v2509_v39, %v916_v20  ;;  %vm1508_vm13 = vcmp.eq.s32.totalorder %v652_v2, 6  ;;  %v785_v10 = vsel %vm717_vm12, %v2505_v43, 0.0  ;;  %v3417_v34 = vld [vmem:[#allocation7_spill] sm:$0xff] }
 0x205   : > { %1771 = vst [vmem:[%s2556_s30 + $0x1b0] sm:$0xff] %v1707_v45  ;;  %v1180_v16 = vsel %vm1112_vm9, %v2511_v42, %v1048_v31  ;;  %vm849_vm14 = vcmp.eq.s32.totalorder %v653_v3, 1  ;;  %vm1640_vm15 = vcmp.eq.s32.totalorder %v652_v2, 7  ;;  %vm981_vm1 = vcmp.eq.s32.totalorder %v653_v3, 2  ;;  %v593_v31 = vpop.permute.xlu1 %592 }
 0x206   : > { %v1312_v13 = vsel %vm1244_vm10, %v2513_v37, %v1180_v16  ;;  %v917_v9 = vsel %vm849_vm14, %v2507_v44, %v785_v10  ;;  %vm1113_vm2 = vcmp.eq.s32.totalorder %v653_v3, 3  ;;  %vm1245_vm3 = vcmp.eq.s32.totalorder %v653_v3, 4 }
 0x207   : > { %v1444_v62 = vsel %vm1376_vm11, %v2515_v35, %v1312_v13  ;;  %v1049_v48 = vsel %vm981_vm1, %v2509_v39, %v917_v9  ;;  %vm1377_vm4 = vcmp.eq.s32.totalorder %v653_v3, 5  ;;  %vm718_vm5 = vcmp.eq.s32.totalorder %v654_v24, 0 }
 0x208   : > { %v1576_v7 = vsel %vm1508_vm13, %v2525_v41, %v1444_v62  ;;  %v1181_v21 = vsel %vm1113_vm2, %v2511_v42, %v1049_v48  ;;  %v786_v52 = vsel %vm718_vm5, %v2505_v43, 0.0  ;;  %vm850_vm6 = vcmp.eq.s32.totalorder %v654_v24, 1  ;;  %v3418_v48 = vld [vmem:[#allocation8_spill] sm:$0xff] }
 0x209   : > { %v1708_v17 = vsel %vm1640_vm15, %v2527_v54, %v1576_v7  ;;  %v1313_v14 = vsel %vm1245_vm3, %v2513_v37, %v1181_v21  ;;  %vm1509_vm7 = vcmp.eq.s32.totalorder %v653_v3, 6  ;;  %v918_v11 = vsel %vm850_vm6, %v2507_v44, %v786_v52 }
 0x20a   : > { %1772 = vst [vmem:[%s2556_s30 + $0x1b8] sm:$0xff] %v1708_v17  ;;  %v1445_v26 = vsel %vm1377_vm4, %v2515_v35, %v1313_v14  ;;  %vm982_vm8 = vcmp.eq.s32.totalorder %v654_v24, 2  ;;  %vm1641_vm9 = vcmp.eq.s32.totalorder %v653_v3, 7  ;;  %vm1114_vm10 = vcmp.eq.s32.totalorder %v654_v24, 3  ;;  %v596_v17 = vpop.permute.xlu0 %595 }
 0x20b   : > { %v1577_v23 = vsel %vm1509_vm7, %v2525_v41, %v1445_v26  ;;  %v1050_v40 = vsel %vm982_vm8, %v2509_v39, %v918_v11  ;;  %vm1246_vm11 = vcmp.eq.s32.totalorder %v654_v24, 4  ;;  %vm1378_vm12 = vcmp.eq.s32.totalorder %v654_v24, 5 }
 0x20c   : > { %v1709_v46 = vsel %vm1641_vm9, %v2527_v54, %v1577_v23  ;;  %v1182_v51 = vsel %vm1114_vm10, %v2511_v42, %v1050_v40  ;;  %vm1510_vm13 = vcmp.eq.s32.totalorder %v654_v24, 6  ;;  %v655_v50 = vsel %vm212_vm0, %v3414_v63, %v581_v18 }
 0x20d   : > { %1773 = vst [vmem:[%s2556_s30 + $0x1c0] sm:$0xff] %v1709_v46  ;;  %v1314_v27 = vsel %vm1246_vm11, %v2513_v37, %v1182_v51  ;;  %vm719_vm14 = vcmp.eq.s32.totalorder %v655_v50, 0  ;;  %vm851_vm15 = vcmp.eq.s32.totalorder %v655_v50, 1  ;;  %v656_v47 = vsel %vm212_vm0, %v3415_v22, %v584_v36  ;;  %v3419_v36 = vld [vmem:[#allocation9_spill] sm:$0xff] }
 0x20e   : > { %v1446_v53 = vsel %vm1378_vm12, %v2515_v35, %v1314_v27  ;;  %vm1642_vm1 = vcmp.eq.s32.totalorder %v654_v24, 7  ;;  %v787_v19 = vsel %vm719_vm14, %v2505_v43, 0.0  ;;  %v657_v33 = vsel %vm212_vm0, %v3416_v57, %v587_v8 }
 0x20f   : > { %v1578_v4 = vsel %vm1510_vm13, %v2525_v41, %v1446_v53  ;;  %v919_v60 = vsel %vm851_vm15, %v2507_v44, %v787_v19  ;;  %vm983_vm2 = vcmp.eq.s32.totalorder %v655_v50, 2  ;;  %vm1115_vm3 = vcmp.eq.s32.totalorder %v655_v50, 3 }
 0x210   : > { %v1710_v32 = vsel %vm1642_vm1, %v2527_v54, %v1578_v4  ;;  %v1051_v55 = vsel %vm983_vm2, %v2509_v39, %v919_v60  ;;  %vm1247_vm4 = vcmp.eq.s32.totalorder %v655_v50, 4  ;;  %vm720_vm5 = vcmp.eq.s32.totalorder %v656_v47, 0 }
 0x211   : > { %1774 = vst [vmem:[%s2556_s30 + $0x1c8] sm:$0xff] %v1710_v32  ;;  %vm852_vm6 = vcmp.eq.s32.totalorder %v656_v47, 1  ;;  %v1183_v61 = vsel %vm1115_vm3, %v2511_v42, %v1051_v55  ;;  %vm1379_vm7 = vcmp.eq.s32.totalorder %v655_v50, 5  ;;  %vm1511_vm8 = vcmp.eq.s32.totalorder %v655_v50, 6 }
 0x212   : > { %v788_v5 = vsel %vm720_vm5, %v2505_v43, 0.0  ;;  %v1315_v59 = vsel %vm1247_vm4, %v2513_v37, %v1183_v61  ;;  %vm1643_vm9 = vcmp.eq.s32.totalorder %v655_v50, 7  ;;  %vm984_vm10 = vcmp.eq.s32.totalorder %v656_v47, 2 }
 0x213   : > { %v920_v12 = vsel %vm852_vm6, %v2507_v44, %v788_v5  ;;  %v1447_v15 = vsel %vm1379_vm7, %v2515_v35, %v1315_v59  ;;  %vm1116_vm11 = vcmp.eq.s32.totalorder %v656_v47, 3  ;;  %vm1248_vm12 = vcmp.eq.s32.totalorder %v656_v47, 4 }
 0x214   : > { %v1052_v58 = vsel %vm984_vm10, %v2509_v39, %v920_v12  ;;  %v1579_v38 = vsel %vm1511_vm8, %v2525_v41, %v1447_v15  ;;  %vm721_vm13 = vcmp.eq.s32.totalorder %v657_v33, 0  ;;  %vm853_vm14 = vcmp.eq.s32.totalorder %v657_v33, 1 }
 0x215   : > { %v1184_v29 = vsel %vm1116_vm11, %v2511_v42, %v1052_v58  ;;  %v1711_v1 = vsel %vm1643_vm9, %v2527_v54, %v1579_v38  ;;  %vm1380_vm15 = vcmp.eq.s32.totalorder %v656_v47, 5  ;;  %v789_v2 = vsel %vm721_vm13, %v2505_v43, 0.0 }
 0x216   : > { %v1316_v0 = vsel %vm1248_vm12, %v2513_v37, %v1184_v29  ;;  %1775 = vst [vmem:[%s2556_s30 + $0x1d0] sm:$0xff] %v1711_v1  ;;  %vm1512_vm1 = vcmp.eq.s32.totalorder %v656_v47, 6  ;;  %v921_v3 = vsel %vm853_vm14, %v2507_v44, %v789_v2  ;;  %vm985_vm2 = vcmp.eq.s32.totalorder %v657_v33, 2 }
 0x217   : > { %v1448_v28 = vsel %vm1380_vm15, %v2515_v35, %v1316_v0  ;;  %vm1644_vm3 = vcmp.eq.s32.totalorder %v656_v47, 7  ;;  %v1053_v6 = vsel %vm985_vm2, %v2509_v39, %v921_v3  ;;  %vm1117_vm4 = vcmp.eq.s32.totalorder %v657_v33, 3 }
 0x218   : > { %v1580_v25 = vsel %vm1512_vm1, %v2525_v41, %v1448_v28  ;;  %v1185_v24 = vsel %vm1117_vm4, %v2511_v42, %v1053_v6  ;;  %vm1249_vm5 = vcmp.eq.s32.totalorder %v657_v33, 4  ;;  %v658_v20 = vsel %vm212_vm0, %v3417_v34, %v590_v49 }
 0x219   : > { %v1712_v30 = vsel %vm1644_vm3, %v2527_v54, %v1580_v25  ;;  %v1317_v45 = vsel %vm1249_vm5, %v2513_v37, %v1185_v24  ;;  %vm1381_vm6 = vcmp.eq.s32.totalorder %v657_v33, 5  ;;  %vm722_vm7 = vcmp.eq.s32.totalorder %v658_v20, 0 }
 0x21a   : > { %1776 = vst [vmem:[%s2556_s30 + $0x1d8] sm:$0xff] %v1712_v30  ;;  %vm854_vm8 = vcmp.eq.s32.totalorder %v658_v20, 1  ;;  %v1449_v16 = vsel %vm1381_vm6, %v2515_v35, %v1317_v45  ;;  %vm1513_vm9 = vcmp.eq.s32.totalorder %v657_v33, 6  ;;  %vm1645_vm10 = vcmp.eq.s32.totalorder %v657_v33, 7 }
 0x21b   : > { %v790_v10 = vsel %vm722_vm7, %v2505_v43, 0.0  ;;  %v1581_v13 = vsel %vm1513_vm9, %v2525_v41, %v1449_v16  ;;  %vm986_vm11 = vcmp.eq.s32.totalorder %v658_v20, 2  ;;  %vm1118_vm12 = vcmp.eq.s32.totalorder %v658_v20, 3 }
 0x21c   : > { %v922_v9 = vsel %vm854_vm8, %v2507_v44, %v790_v10  ;;  %v1713_v18 = vsel %vm1645_vm10, %v2527_v54, %v1581_v13  ;;  %vm1250_vm13 = vcmp.eq.s32.totalorder %v658_v20, 4  ;;  %v659_v7 = vsel %vm212_vm0, %v3418_v48, %v593_v31 }
 0x21d   : > { %v1054_v62 = vsel %vm986_vm11, %v2509_v39, %v922_v9  ;;  %1777 = vst [vmem:[%s2556_s30 + $0x1e0] sm:$0xff] %v1713_v18  ;;  %vm1382_vm14 = vcmp.eq.s32.totalorder %v658_v20, 5  ;;  %vm723_vm15 = vcmp.eq.s32.totalorder %v659_v7, 0  ;;  %vm855_vm1 = vcmp.eq.s32.totalorder %v659_v7, 1 }
 0x21e   : > { %v1186_v21 = vsel %vm1118_vm12, %v2511_v42, %v1054_v62  ;;  %vm1514_vm2 = vcmp.eq.s32.totalorder %v658_v20, 6  ;;  %vm1646_vm3 = vcmp.eq.s32.totalorder %v658_v20, 7  ;;  %v791_v52 = vsel %vm723_vm15, %v2505_v43, 0.0 }
 0x21f   : > { %v1318_v14 = vsel %vm1250_vm13, %v2513_v37, %v1186_v21  ;;  %v923_v11 = vsel %vm855_vm1, %v2507_v44, %v791_v52  ;;  %vm987_vm4 = vcmp.eq.s32.totalorder %v659_v7, 2  ;;  %vm1119_vm5 = vcmp.eq.s32.totalorder %v659_v7, 3 }
 0x220   : > { %v1450_v26 = vsel %vm1382_vm14, %v2515_v35, %v1318_v14  ;;  %v1055_v40 = vsel %vm987_vm4, %v2509_v39, %v923_v11  ;;  %vm1251_vm6 = vcmp.eq.s32.totalorder %v659_v7, 4  ;;  %v660_v46 = vsel %vm212_vm0, %v3419_v36, %v596_v17 }
 0x221   : > { %v1582_v23 = vsel %vm1514_vm2, %v2525_v41, %v1450_v26  ;;  %v1187_v8 = vsel %vm1119_vm5, %v2511_v42, %v1055_v40  ;;  %vm724_vm7 = vcmp.eq.s32.totalorder %v660_v46, 0  ;;  %vm856_vm8 = vcmp.eq.s32.totalorder %v660_v46, 1 }
 0x222   : > { %v1714_v51 = vsel %vm1646_vm3, %v2527_v54, %v1582_v23  ;;  %v1319_v27 = vsel %vm1251_vm6, %v2513_v37, %v1187_v8  ;;  %vm1383_vm9 = vcmp.eq.s32.totalorder %v659_v7, 5  ;;  %v792_v63 = vsel %vm724_vm7, %v2505_v43, 0.0 }
 0x223   : > { %1778 = vst [vmem:[%s2556_s30 + $0x1e8] sm:$0xff] %v1714_v51  ;;  %v1451_v50 = vsel %vm1383_vm9, %v2515_v35, %v1319_v27  ;;  %vm1515_vm10 = vcmp.eq.s32.totalorder %v659_v7, 6  ;;  %v924_v56 = vsel %vm856_vm8, %v2507_v44, %v792_v63  ;;  %vm988_vm0 = vcmp.eq.s32.totalorder %v660_v46, 2 }
 0x224   : > { %v1583_v53 = vsel %vm1515_vm10, %v2525_v41, %v1451_v50  ;;  %vm1647_vm11 = vcmp.eq.s32.totalorder %v659_v7, 7  ;;  %v1056_v22 = vsel %vm988_vm0, %v2509_v39, %v924_v56  ;;  %vm1120_vm12 = vcmp.eq.s32.totalorder %v660_v46, 3 }
 0x225   : > { %v1715_v47 = vsel %vm1647_vm11, %v2527_v54, %v1583_v53  ;;  %v1188_v43 = vsel %vm1120_vm12, %v2511_v42, %v1056_v22  ;;  %vm1252_vm13 = vcmp.eq.s32.totalorder %v660_v46, 4  ;;  %vm1384_vm14 = vcmp.eq.s32.totalorder %v660_v46, 5 }
 0x226   : > { %1779 = vst [vmem:[%s2556_s30 + $0x1f0] sm:$0xff] %v1715_v47  ;;  %v1320_v44 = vsel %vm1252_vm13, %v2513_v37, %v1188_v43  ;;  %vm1516_vm15 = vcmp.eq.s32.totalorder %v660_v46, 6  ;;  %vm1648_vm1 = vcmp.eq.s32.totalorder %v660_v46, 7 }
 0x227   : > { %v1452_v4 = vsel %vm1384_vm14, %v2515_v35, %v1320_v44 }
 0x228   : > { %v1584_v39 = vsel %vm1516_vm15, %v2525_v41, %v1452_v4 }
 0x229   : > { %v1716_v42 = vsel %vm1648_vm1, %v2527_v54, %v1584_v39 }
 0x22a   : > { %1780 = vst [vmem:[%s2556_s30 + $0x1f8] sm:$0xff] %v1716_v42 }
 0x22b   : > { %1930 = shalt.err (!%p1927_p3)
}
 0x22c   : > { %s1931_s21 = scalar_lea.hbm %s3301_s7, 8192  ;;  %s1935_s24 = scalar_lea.hbm %s3352_s2, 16384 }
 0x22d   : > { %p1932_p4 = scmp.ne.s32.totalorder %s3301_s7, %s1931_s21  ;;  %p1936_p9 = scmp.lt.s32.totalorder %s3301_s7, %s3352_s2 }
 0x22e   : > { %p1937_p10 = scmp.lt.s32.totalorder %s1935_s24, %s1931_s21 }
 0x22f   : > { %p1933_p7 = pnand %p1932_p4, %p2037_p5 }
 0x230   : > { %p1938_p11 = por %p1937_p10, %p1936_p9 }
 0x231   : > { %p1934_p8 = pneg %p1933_p7 }
 0x233   : > { %p1939_p12 = pnand %p1938_p11, %p1934_p8 }
 0x235   : > { %1942 = shalt.err (!%p1939_p12)
}
 0x236   : > { %s1982_s27 = smov 128   ;;  %s1983_s28 = smov 8  }
 0x237   : > { %1870 = dma.vmem_to_hbm [thread:$0]  (%p2037_p5), %s3303_s4, 8192, %s3301_s7, %s3310_s8, %s1982_s27, %s1982_s27, %s1983_s28  }
 0x238 PF: > { %p1876_p13 = scmp.ge.s32.totalorder %s1977_s12, 2  ;;  %s1810_s29 = sand.u32 1, %s1965_s9  }
 0x239   : > { %s1811_s30 = scalar_lea.sflag [#allocation3], %s1810_s29 }
 0x23a   : > { %p1873_p0 = pnand %p1876_p13, %p2041_p6 }
 0x23c   : > { %p1874_p1 = pneg %p1873_p0 }
 0x23e   : > { %1960 = dma.done.wait (%p1874_p1), %s1811_s30, 8192  }
 0x23f   : > { %1962 = vsyncadd (%p1874_p1), %s1811_s30, 4294959104  ;;  %p12_p2 = scmp.ge.s32.totalorder %s2024_s15, 4   ;;  %s3420_s9 = smov %s1969_s10 }
 0x240   : > { %s3421_s10 = smov %s1973_s11  ;;  %s3422_s11 = smov %s2035_s18 }
 0x241   : > { %s3423_s12 = smov %s2024_s15  ;;  %14 = sbr.rel (!%p12_p2) target bundleno = 3 (0x3), region = 63 }
 0x246   :  { %1816 = vsyncpa [#allocation3], 1 }
 0x247   :  { %1818 = vsyncpa [#allocation3 + $0x1], 1 }

</bundles_post_ra>
